<compile_context>
chip_gen: v6e
topology: v6e:2x2x1
jax: 0.10.0
libtpu: 0.0.40
codegen_flags: <defaults>
</compile_context>

<pallas_src>
import jax
import jax.numpy as jnp
from jax import lax
from jax.experimental import pallas as pl
from jax.experimental.pallas import tpu as pltpu

INPUT_SIZE = 1
HIDDEN = 64
BATCH = 2
SEQ = 8

# Packed gate order: sigmoid gates first (i, f, o), tanh gate (g) last, so per-step EUP work
# splits at a 128-lane boundary. PyTorch's native gate order is (i, f, g, o).
GATE_ORDER = (0, 1, 3, 2)  # indices into PyTorch (i, f, g, o) blocks -> packed (i, f, o, g)


def lstm_linear_kernel(x_ref, wrec_hbm, win_ref, ball_ref, wl_ref, bl_ref,
                       out_ref, wrec_vmem, dma_sem):
    T, B, _ = x_ref.shape
    H2 = wrec_vmem.shape[0]          # 2*H (packed [layer0 | layer1] state width) = 128

    # Kick off the (128, 512) bf16 recurrent-weight DMA immediately; nothing before the first
    # MXU push needs it, so the copy overlaps the hoisted `add` and the t=0 prologue cell.
    wrec_cp = pltpu.make_async_copy(wrec_hbm, wrec_vmem, dma_sem)
    wrec_cp.start()

    win = win_ref[...]               # (1, 8H) packed input weight (wih0 in layer0 cols, 0 else)
    ball = ball_ref[...]             # (1, 8H) packed biases (b0 in layer0 cols, b1 in layer1 cols)

    # Hoisted input-gate contribution for ALL timesteps, time-major: add[t] is a leading-axis
    # whole-slab select, so only a cheap VPU add remains on the serial chain.
    #   add[t, :, layer0 cols] = x[t] * W_ih0 + b0 ;  add[t, :, layer1 cols] = b1
    add = x_ref[...] * win + ball    # (T, B, 1)*(1, 8H)+(1, 8H) -> (T, B, 8H)

    def cell2(gates, c_prev):
        # gates: (B, 8H) packed [i|f|o|g] x [layer0|layer1]; c_prev: (B, 2H).
        # Sigmoid only on the 3 sigmoid gates, tanh only on g; all slices 128-lane aligned.
        sg = jax.nn.sigmoid(gates[:, :3 * H2])
        g = jnp.tanh(gates[:, 3 * H2:])
        i = sg[:, 0 * H2:1 * H2]
        f = sg[:, 1 * H2:2 * H2]
        o = sg[:, 2 * H2:3 * H2]
        c = f * c_prev + i * g
        h = o * jnp.tanh(c)
        return h, c

    # --- Prologue: layer0 @ t=0 (h0_prev = 0 -> no recurrent matmul needed). ---
    # Run the packed cell and zero the layer1 half so h1[-1] = c1[-1] = 0 stay exact.
    layer0_mask = (lax.broadcasted_iota(jnp.int32, (1, H2), 1) < (H2 // 2)).astype(jnp.float32)
    h_cat, c_cat = cell2(add[0], jnp.zeros((B, H2), jnp.float32))
    h_cat = h_cat * layer0_mask
    c_cat = c_cat * layer0_mask

    # Recurrent weights must be resident before the first MXU push.
    wrec_cp.wait()
    wrec = wrec_vmem[...]            # (2H, 8H) bf16 block-packed recurrent + layer1-input weights

    # --- Wavefront recurrence (fully unrolled): iteration t computes layer0@t and layer1@(t-1)
    #     from ONE fused bf16 MXU matmul:  [h0[t-1] | h1[t-2]] @ wrec  (f32 accumulate). ---
    # TODO(synk): if bundle dumps show Mosaic re-pushing the loop-invariant RHS each step, switch
    # to explicit pltpu.matmul_push_rhs / matmul_acc_lhs / matmul_pop to latch wrec in the MXU.
    for t in range(1, T):
        gates = jnp.dot(h_cat.astype(jnp.bfloat16), wrec,
                        preferred_element_type=jnp.float32) + add[t]
        h_cat, c_cat = cell2(gates, c_cat)

    # --- Epilogue: layer1 @ t=T-1 (layer0 columns of this step are unused). ---
    # TODO(synk): a 256-wide layer1-only epilogue weight would halve this step's MXU/EUP work, but
    # at H=64 its gate slices fall on 64-lane boundaries; kept full-width for clean vreg layout.
    gates = jnp.dot(h_cat.astype(jnp.bfloat16), wrec,
                    preferred_element_type=jnp.float32) + ball
    h_cat, _ = cell2(gates, c_cat)

    # Final Linear(hidden, 1) as a VPU multiply + cross-lane reduce (no MXU push/drain for N=1).
    # wl row is zero over the layer0 half, so no sub-vreg slice of h1 is needed.
    out_ref[...] = jnp.sum(h_cat * wl_ref[...], axis=-1, keepdims=True) + bl_ref[...]


def pack_params(p):
    """One-time repack of natural-layout params into the fused/gate-major kernel layout."""
    H = p["whh0"].shape[0]
    Z = jnp.zeros((H, H), jnp.float32)
    z1 = jnp.zeros((1, H), jnp.float32)

    def gate(w, k):  # k-th gate block (PyTorch order i,f,g,o) of a (., 4H) matrix
        return w[:, k * H:(k + 1) * H]

    # Recurrent weight: rows = [h0 | h1], cols gate-major in packed (i,f,o,g) order, each gate
    # block laid out [layer0 | layer1]:
    #   layer0 cols get whh0 (top rows) / 0 (bottom); layer1 cols get wih1 (top) / whh1 (bottom).
    col_groups = []
    for k in GATE_ORDER:
        top = jnp.concatenate([gate(p["whh0"], k), gate(p["wih1"], k)], axis=1)   # (H, 2H)
        bot = jnp.concatenate([Z, gate(p["whh1"], k)], axis=1)                    # (H, 2H)
        col_groups.append(jnp.concatenate([top, bot], axis=0))                    # (2H, 2H)
    # bf16: MXU-native on v5e/v6e/v7x and half the HBM->VMEM weight DMA.
    w_rec = jnp.concatenate(col_groups, axis=1).astype(jnp.bfloat16)              # (2H, 8H)

    win_cols, b_cols = [], []
    for k in GATE_ORDER:
        win_cols += [gate(p["wih0"], k), z1]
        b_cols += [gate(p["b0"], k), gate(p["b1"], k)]
    w_in = jnp.concatenate(win_cols, axis=1)    # (1, 8H) f32
    b_all = jnp.concatenate(b_cols, axis=1)     # (1, 8H) f32

    # Final Linear packed as a (1, 2H) row over [h0 | h1] (zeros for the h0 half) so the output
    # projection is a VPU mul + cross-lane reduce instead of an N=1 MXU matmul.
    wl_row = jnp.concatenate([jnp.zeros((1, H), jnp.float32), p["wl"].T], axis=1)  # (1, 2H)
    return {"w_rec": w_rec, "w_in": w_in, "b_all": b_all, "wl": wl_row, "bl": p["bl"]}


def price_predictor_forward(x, packed):
    """x: (B, T, INPUT_SIZE) float32, batch-first (PyTorch convention). packed: pack_params output."""
    B = x.shape[0]
    H2, G8 = packed["w_rec"].shape
    # Time-major inside the kernel so the per-step addend slice is a leading-axis slab select.
    x_tmajor = jnp.transpose(x, (1, 0, 2))     # (T, B, 1)
    vmem = pl.BlockSpec(memory_space=pltpu.MemorySpace.VMEM)
    return pl.pallas_call(
        lstm_linear_kernel,
        out_shape=jax.ShapeDtypeStruct((B, 1), jnp.float32),
        in_specs=[vmem,                               # x (time-major)
                  pl.BlockSpec(memory_space=pl.ANY),  # w_rec stays in HBM; DMA'd inside the kernel
                  vmem, vmem, vmem, vmem],
        out_specs=vmem,
        scratch_shapes=[pltpu.VMEM((H2, G8), jnp.bfloat16),  # w_rec landing buffer
                        pltpu.SemaphoreType.DMA],
    )(x_tmajor, packed["w_rec"], packed["w_in"], packed["b_all"], packed["wl"], packed["bl"])


def init_params(key, input_size=INPUT_SIZE, hidden=HIDDEN):
    """Deterministic init mimicking PyTorch's uniform(-1/sqrt(H), 1/sqrt(H)), natural layout."""
    ks = jax.random.split(key, 10)
    s = 1.0 / float(jnp.sqrt(hidden))

    def u(k, shape):
        return jax.random.uniform(k, shape, jnp.float32, -s, s)

    return {
        # layer 0 (input_size -> hidden), stored transposed: (in, 4H), (H, 4H)
        "wih0": u(ks[0], (input_size, 4 * hidden)),
        "whh0": u(ks[1], (hidden, 4 * hidden)),
        "b0": u(ks[2], (1, 4 * hidden)) + u(ks[3], (1, 4 * hidden)),  # b_ih + b_hh
        # layer 1 (hidden -> hidden)
        "wih1": u(ks[4], (hidden, 4 * hidden)),
        "whh1": u(ks[5], (hidden, 4 * hidden)),
        "b1": u(ks[6], (1, 4 * hidden)) + u(ks[7], (1, 4 * hidden)),
        # final Linear(hidden, 1), stored transposed: (H, 1)
        "wl": u(ks[8], (hidden, 1)),
        "bl": u(ks[9], (1, 1)),
    }


def reference_forward(x, p):
    """Pure-JAX f32 reference matching nn.LSTM(batch_first=True) + Linear, natural params."""
    B, T, _ = x.shape
    H = p["whh0"].shape[0]

    def cell(gates, c):
        i = jax.nn.sigmoid(gates[:, :H])
        f = jax.nn.sigmoid(gates[:, H:2 * H])
        g = jnp.tanh(gates[:, 2 * H:3 * H])
        o = jax.nn.sigmoid(gates[:, 3 * H:])
        c = f * c + i * g
        return o * jnp.tanh(c), c

    h0 = c0 = h1 = c1 = jnp.zeros((B, H), jnp.float32)
    for t in range(T):
        x_t = x[:, t, :]
        g0 = x_t @ p["wih0"] + h0 @ p["whh0"] + p["b0"]
        h0, c0 = cell(g0, c0)
        g1 = h0 @ p["wih1"] + h1 @ p["whh1"] + p["b1"]
        h1, c1 = cell(g1, c1)
    return h1 @ p["wl"] + p["bl"]


if __name__ == "__main__":
    key = jax.random.PRNGKey(0)
    k_x, k_p = jax.random.split(key)
    x = jax.random.normal(k_x, (BATCH, SEQ, INPUT_SIZE), jnp.float32)
    params = init_params(k_p)
    packed = pack_params(params)  # one-time weight packing (param prep, not per-call work)

    out = price_predictor_forward(x, packed)
    out = jax.block_until_ready(out)

    ref = reference_forward(x, params)
    assert out.shape == (BATCH, 1)
    # Tolerance sized for the bf16 recurrent-weight MXU path (state, biases, accumulation stay f32).
    assert jnp.allclose(out, ref, atol=5e-3, rtol=5e-3), (out, ref)
    print("KERNEL_OK")
</pallas_src>

<mosaic_0001>
module attributes {stable_mosaic.version = 11 : i64} {
  func.func @lstm_linear_kernel(%arg0: memref<8x2x1xf32, #tpu.memory_space<vmem>>, %arg1: memref<128x512xbf16, #tpu.memory_space<any>>, %arg2: memref<1x512xf32, #tpu.memory_space<vmem>>, %arg3: memref<1x512xf32, #tpu.memory_space<vmem>>, %arg4: memref<1x128xf32, #tpu.memory_space<vmem>>, %arg5: memref<1x1xf32, #tpu.memory_space<vmem>>, %arg6: memref<2x1xf32, #tpu.memory_space<vmem>>, %arg7: memref<128x512xbf16, #tpu.memory_space<vmem>>, %arg8: memref<!tpu.dma_semaphore, #tpu.memory_space<semaphore_mem>>) attributes {dimension_semantics = [], scalar_prefetch = 0 : i64, scratch_operands = 2 : i64, tpu.core_type = #tpu.core_type<tc>} {
    tpu.enqueue_dma source(%arg1 : memref<128x512xbf16, #tpu.memory_space<any>>) target(%arg7 : memref<128x512xbf16, #tpu.memory_space<vmem>>) target_semaphore(%arg8 : memref<!tpu.dma_semaphore, #tpu.memory_space<semaphore_mem>>)
    %c0 = arith.constant 0 : index
    %c0_0 = arith.constant 0 : index
    %0 = vector.load %arg2[%c0, %c0_0] : memref<1x512xf32, #tpu.memory_space<vmem>>, vector<1x512xf32>
    %c0_1 = arith.constant 0 : index
    %c0_2 = arith.constant 0 : index
    %1 = vector.load %arg3[%c0_1, %c0_2] : memref<1x512xf32, #tpu.memory_space<vmem>>, vector<1x512xf32>
    %c0_3 = arith.constant 0 : index
    %c0_4 = arith.constant 0 : index
    %c0_5 = arith.constant 0 : index
    %2 = vector.load %arg0[%c0_3, %c0_4, %c0_5] : memref<8x2x1xf32, #tpu.memory_space<vmem>>, vector<8x2x1xf32>
    %3 = vector.shape_cast %0 : vector<1x512xf32> to vector<1x1x512xf32>
    %4 = vector.broadcast %2 : vector<8x2x1xf32> to vector<8x2x512xf32>
    %5 = vector.broadcast %3 : vector<1x1x512xf32> to vector<8x2x512xf32>
    %6 = arith.mulf %4, %5 : vector<8x2x512xf32>
    %7 = vector.shape_cast %1 : vector<1x512xf32> to vector<1x1x512xf32>
    %8 = vector.broadcast %7 : vector<1x1x512xf32> to vector<8x2x512xf32>
    %9 = arith.addf %6, %8 : vector<8x2x512xf32>
    %10 = tpu.iota {dimensions = array<i32: 1>} : vector<1x128xi32>
    %c64_i32 = arith.constant 64 : i32
    %11 = vector.broadcast %c64_i32 : i32 to vector<1x128xi32>
    %12 = arith.cmpi slt, %10, %11 : vector<1x128xi32>
    %13 = arith.extui %12 : vector<1x128xi1> to vector<1x128xi32>
    %14 = arith.sitofp %13 : vector<1x128xi32> to vector<1x128xf32>
    %15 = vector.extract_strided_slice %9 {offsets = [0, 0, 0], sizes = [1, 2, 512], strides = [1, 1, 1]} : vector<8x2x512xf32> to vector<1x2x512xf32>
    %16 = vector.shape_cast %15 : vector<1x2x512xf32> to vector<2x512xf32>
    %cst = arith.constant 0.000000e+00 : f32
    %17 = vector.broadcast %cst : f32 to vector<2x128xf32>
    %18 = vector.extract_strided_slice %16 {offsets = [0, 0], sizes = [2, 384], strides = [1, 1]} : vector<2x512xf32> to vector<2x384xf32>
    %19 = arith.negf %18 : vector<2x384xf32>
    %20 = math.exp %19 : vector<2x384xf32>
    %cst_6 = arith.constant 1.000000e+00 : f32
    %21 = vector.broadcast %cst_6 : f32 to vector<2x384xf32>
    %22 = arith.addf %21, %20 : vector<2x384xf32>
    %23 = arith.divf %21, %22 : vector<2x384xf32>
    %24 = vector.extract_strided_slice %16 {offsets = [0, 384], sizes = [2, 128], strides = [1, 1]} : vector<2x512xf32> to vector<2x128xf32>
    %25 = math.tanh %24 : vector<2x128xf32>
    %26 = vector.extract_strided_slice %23 {offsets = [0, 0], sizes = [2, 128], strides = [1, 1]} : vector<2x384xf32> to vector<2x128xf32>
    %27 = vector.extract_strided_slice %23 {offsets = [0, 128], sizes = [2, 128], strides = [1, 1]} : vector<2x384xf32> to vector<2x128xf32>
    %28 = vector.extract_strided_slice %23 {offsets = [0, 256], sizes = [2, 128], strides = [1, 1]} : vector<2x384xf32> to vector<2x128xf32>
    %29 = arith.mulf %27, %17 : vector<2x128xf32>
    %30 = arith.mulf %26, %25 : vector<2x128xf32>
    %31 = arith.addf %29, %30 : vector<2x128xf32>
    %32 = math.tanh %31 : vector<2x128xf32>
    %33 = arith.mulf %28, %32 : vector<2x128xf32>
    %34 = vector.broadcast %14 : vector<1x128xf32> to vector<2x128xf32>
    %35 = arith.mulf %33, %34 : vector<2x128xf32>
    %36 = vector.broadcast %14 : vector<1x128xf32> to vector<2x128xf32>
    %37 = arith.mulf %31, %36 : vector<2x128xf32>
    tpu.wait_dma2 semaphore(%arg8 : memref<!tpu.dma_semaphore, #tpu.memory_space<semaphore_mem>>) src(%arg1 : memref<128x512xbf16, #tpu.memory_space<any>>) dst(%arg7 : memref<128x512xbf16, #tpu.memory_space<vmem>>)
    %c0_7 = arith.constant 0 : index
    %c0_8 = arith.constant 0 : index
    %38 = vector.load %arg7[%c0_7, %c0_8] : memref<128x512xbf16, #tpu.memory_space<vmem>>, vector<128x512xbf16>
    %39 = arith.truncf %35 : vector<2x128xf32> to vector<2x128xbf16>
    %cst_9 = arith.constant dense<0.000000e+00> : vector<2x512xf32>
    %40 = tpu.matmul %39, %38, %cst_9 {dimension_numbers = #tpu.dot_dimension_numbers<[1], [0], [0], [1], [0, 0, 1, 1], [], []>} : vector<2x128xbf16>, vector<128x512xbf16>, vector<2x512xf32> -> vector<2x512xf32>
    %41 = vector.extract_strided_slice %9 {offsets = [1, 0, 0], sizes = [1, 2, 512], strides = [1, 1, 1]} : vector<8x2x512xf32> to vector<1x2x512xf32>
    %42 = vector.shape_cast %41 : vector<1x2x512xf32> to vector<2x512xf32>
    %43 = arith.addf %40, %42 : vector<2x512xf32>
    %44 = vector.extract_strided_slice %43 {offsets = [0, 0], sizes = [2, 384], strides = [1, 1]} : vector<2x512xf32> to vector<2x384xf32>
    %45 = arith.negf %44 : vector<2x384xf32>
    %46 = math.exp %45 : vector<2x384xf32>
    %cst_10 = arith.constant 1.000000e+00 : f32
    %47 = vector.broadcast %cst_10 : f32 to vector<2x384xf32>
    %48 = arith.addf %47, %46 : vector<2x384xf32>
    %49 = arith.divf %47, %48 : vector<2x384xf32>
    %50 = vector.extract_strided_slice %43 {offsets = [0, 384], sizes = [2, 128], strides = [1, 1]} : vector<2x512xf32> to vector<2x128xf32>
    %51 = math.tanh %50 : vector<2x128xf32>
    %52 = vector.extract_strided_slice %49 {offsets = [0, 0], sizes = [2, 128], strides = [1, 1]} : vector<2x384xf32> to vector<2x128xf32>
    %53 = vector.extract_strided_slice %49 {offsets = [0, 128], sizes = [2, 128], strides = [1, 1]} : vector<2x384xf32> to vector<2x128xf32>
    %54 = vector.extract_strided_slice %49 {offsets = [0, 256], sizes = [2, 128], strides = [1, 1]} : vector<2x384xf32> to vector<2x128xf32>
    %55 = arith.mulf %53, %37 : vector<2x128xf32>
    %56 = arith.mulf %52, %51 : vector<2x128xf32>
    %57 = arith.addf %55, %56 : vector<2x128xf32>
    %58 = math.tanh %57 : vector<2x128xf32>
    %59 = arith.mulf %54, %58 : vector<2x128xf32>
    %60 = arith.truncf %59 : vector<2x128xf32> to vector<2x128xbf16>
    %cst_11 = arith.constant dense<0.000000e+00> : vector<2x512xf32>
    %61 = tpu.matmul %60, %38, %cst_11 {dimension_numbers = #tpu.dot_dimension_numbers<[1], [0], [0], [1], [0, 0, 1, 1], [], []>} : vector<2x128xbf16>, vector<128x512xbf16>, vector<2x512xf32> -> vector<2x512xf32>
    %62 = vector.extract_strided_slice %9 {offsets = [2, 0, 0], sizes = [1, 2, 512], strides = [1, 1, 1]} : vector<8x2x512xf32> to vector<1x2x512xf32>
    %63 = vector.shape_cast %62 : vector<1x2x512xf32> to vector<2x512xf32>
    %64 = arith.addf %61, %63 : vector<2x512xf32>
    %65 = vector.extract_strided_slice %64 {offsets = [0, 0], sizes = [2, 384], strides = [1, 1]} : vector<2x512xf32> to vector<2x384xf32>
    %66 = arith.negf %65 : vector<2x384xf32>
    %67 = math.exp %66 : vector<2x384xf32>
    %cst_12 = arith.constant 1.000000e+00 : f32
    %68 = vector.broadcast %cst_12 : f32 to vector<2x384xf32>
    %69 = arith.addf %68, %67 : vector<2x384xf32>
    %70 = arith.divf %68, %69 : vector<2x384xf32>
    %71 = vector.extract_strided_slice %64 {offsets = [0, 384], sizes = [2, 128], strides = [1, 1]} : vector<2x512xf32> to vector<2x128xf32>
    %72 = math.tanh %71 : vector<2x128xf32>
    %73 = vector.extract_strided_slice %70 {offsets = [0, 0], sizes = [2, 128], strides = [1, 1]} : vector<2x384xf32> to vector<2x128xf32>
    %74 = vector.extract_strided_slice %70 {offsets = [0, 128], sizes = [2, 128], strides = [1, 1]} : vector<2x384xf32> to vector<2x128xf32>
    %75 = vector.extract_strided_slice %70 {offsets = [0, 256], sizes = [2, 128], strides = [1, 1]} : vector<2x384xf32> to vector<2x128xf32>
    %76 = arith.mulf %74, %57 : vector<2x128xf32>
    %77 = arith.mulf %73, %72 : vector<2x128xf32>
    %78 = arith.addf %76, %77 : vector<2x128xf32>
    %79 = math.tanh %78 : vector<2x128xf32>
    %80 = arith.mulf %75, %79 : vector<2x128xf32>
    %81 = arith.truncf %80 : vector<2x128xf32> to vector<2x128xbf16>
    %cst_13 = arith.constant dense<0.000000e+00> : vector<2x512xf32>
    %82 = tpu.matmul %81, %38, %cst_13 {dimension_numbers = #tpu.dot_dimension_numbers<[1], [0], [0], [1], [0, 0, 1, 1], [], []>} : vector<2x128xbf16>, vector<128x512xbf16>, vector<2x512xf32> -> vector<2x512xf32>
    %83 = vector.extract_strided_slice %9 {offsets = [3, 0, 0], sizes = [1, 2, 512], strides = [1, 1, 1]} : vector<8x2x512xf32> to vector<1x2x512xf32>
    %84 = vector.shape_cast %83 : vector<1x2x512xf32> to vector<2x512xf32>
    %85 = arith.addf %82, %84 : vector<2x512xf32>
    %86 = vector.extract_strided_slice %85 {offsets = [0, 0], sizes = [2, 384], strides = [1, 1]} : vector<2x512xf32> to vector<2x384xf32>
    %87 = arith.negf %86 : vector<2x384xf32>
    %88 = math.exp %87 : vector<2x384xf32>
    %cst_14 = arith.constant 1.000000e+00 : f32
    %89 = vector.broadcast %cst_14 : f32 to vector<2x384xf32>
    %90 = arith.addf %89, %88 : vector<2x384xf32>
    %91 = arith.divf %89, %90 : vector<2x384xf32>
    %92 = vector.extract_strided_slice %85 {offsets = [0, 384], sizes = [2, 128], strides = [1, 1]} : vector<2x512xf32> to vector<2x128xf32>
    %93 = math.tanh %92 : vector<2x128xf32>
    %94 = vector.extract_strided_slice %91 {offsets = [0, 0], sizes = [2, 128], strides = [1, 1]} : vector<2x384xf32> to vector<2x128xf32>
    %95 = vector.extract_strided_slice %91 {offsets = [0, 128], sizes = [2, 128], strides = [1, 1]} : vector<2x384xf32> to vector<2x128xf32>
    %96 = vector.extract_strided_slice %91 {offsets = [0, 256], sizes = [2, 128], strides = [1, 1]} : vector<2x384xf32> to vector<2x128xf32>
    %97 = arith.mulf %95, %78 : vector<2x128xf32>
    %98 = arith.mulf %94, %93 : vector<2x128xf32>
    %99 = arith.addf %97, %98 : vector<2x128xf32>
    %100 = math.tanh %99 : vector<2x128xf32>
    %101 = arith.mulf %96, %100 : vector<2x128xf32>
    %102 = arith.truncf %101 : vector<2x128xf32> to vector<2x128xbf16>
    %cst_15 = arith.constant dense<0.000000e+00> : vector<2x512xf32>
    %103 = tpu.matmul %102, %38, %cst_15 {dimension_numbers = #tpu.dot_dimension_numbers<[1], [0], [0], [1], [0, 0, 1, 1], [], []>} : vector<2x128xbf16>, vector<128x512xbf16>, vector<2x512xf32> -> vector<2x512xf32>
    %104 = vector.extract_strided_slice %9 {offsets = [4, 0, 0], sizes = [1, 2, 512], strides = [1, 1, 1]} : vector<8x2x512xf32> to vector<1x2x512xf32>
    %105 = vector.shape_cast %104 : vector<1x2x512xf32> to vector<2x512xf32>
    %106 = arith.addf %103, %105 : vector<2x512xf32>
    %107 = vector.extract_strided_slice %106 {offsets = [0, 0], sizes = [2, 384], strides = [1, 1]} : vector<2x512xf32> to vector<2x384xf32>
    %108 = arith.negf %107 : vector<2x384xf32>
    %109 = math.exp %108 : vector<2x384xf32>
    %cst_16 = arith.constant 1.000000e+00 : f32
    %110 = vector.broadcast %cst_16 : f32 to vector<2x384xf32>
    %111 = arith.addf %110, %109 : vector<2x384xf32>
    %112 = arith.divf %110, %111 : vector<2x384xf32>
    %113 = vector.extract_strided_slice %106 {offsets = [0, 384], sizes = [2, 128], strides = [1, 1]} : vector<2x512xf32> to vector<2x128xf32>
    %114 = math.tanh %113 : vector<2x128xf32>
    %115 = vector.extract_strided_slice %112 {offsets = [0, 0], sizes = [2, 128], strides = [1, 1]} : vector<2x384xf32> to vector<2x128xf32>
    %116 = vector.extract_strided_slice %112 {offsets = [0, 128], sizes = [2, 128], strides = [1, 1]} : vector<2x384xf32> to vector<2x128xf32>
    %117 = vector.extract_strided_slice %112 {offsets = [0, 256], sizes = [2, 128], strides = [1, 1]} : vector<2x384xf32> to vector<2x128xf32>
    %118 = arith.mulf %116, %99 : vector<2x128xf32>
    %119 = arith.mulf %115, %114 : vector<2x128xf32>
    %120 = arith.addf %118, %119 : vector<2x128xf32>
    %121 = math.tanh %120 : vector<2x128xf32>
    %122 = arith.mulf %117, %121 : vector<2x128xf32>
    %123 = arith.truncf %122 : vector<2x128xf32> to vector<2x128xbf16>
    %cst_17 = arith.constant dense<0.000000e+00> : vector<2x512xf32>
    %124 = tpu.matmul %123, %38, %cst_17 {dimension_numbers = #tpu.dot_dimension_numbers<[1], [0], [0], [1], [0, 0, 1, 1], [], []>} : vector<2x128xbf16>, vector<128x512xbf16>, vector<2x512xf32> -> vector<2x512xf32>
    %125 = vector.extract_strided_slice %9 {offsets = [5, 0, 0], sizes = [1, 2, 512], strides = [1, 1, 1]} : vector<8x2x512xf32> to vector<1x2x512xf32>
    %126 = vector.shape_cast %125 : vector<1x2x512xf32> to vector<2x512xf32>
    %127 = arith.addf %124, %126 : vector<2x512xf32>
    %128 = vector.extract_strided_slice %127 {offsets = [0, 0], sizes = [2, 384], strides = [1, 1]} : vector<2x512xf32> to vector<2x384xf32>
    %129 = arith.negf %128 : vector<2x384xf32>
    %130 = math.exp %129 : vector<2x384xf32>
    %cst_18 = arith.constant 1.000000e+00 : f32
    %131 = vector.broadcast %cst_18 : f32 to vector<2x384xf32>
    %132 = arith.addf %131, %130 : vector<2x384xf32>
    %133 = arith.divf %131, %132 : vector<2x384xf32>
    %134 = vector.extract_strided_slice %127 {offsets = [0, 384], sizes = [2, 128], strides = [1, 1]} : vector<2x512xf32> to vector<2x128xf32>
    %135 = math.tanh %134 : vector<2x128xf32>
    %136 = vector.extract_strided_slice %133 {offsets = [0, 0], sizes = [2, 128], strides = [1, 1]} : vector<2x384xf32> to vector<2x128xf32>
    %137 = vector.extract_strided_slice %133 {offsets = [0, 128], sizes = [2, 128], strides = [1, 1]} : vector<2x384xf32> to vector<2x128xf32>
    %138 = vector.extract_strided_slice %133 {offsets = [0, 256], sizes = [2, 128], strides = [1, 1]} : vector<2x384xf32> to vector<2x128xf32>
    %139 = arith.mulf %137, %120 : vector<2x128xf32>
    %140 = arith.mulf %136, %135 : vector<2x128xf32>
    %141 = arith.addf %139, %140 : vector<2x128xf32>
    %142 = math.tanh %141 : vector<2x128xf32>
    %143 = arith.mulf %138, %142 : vector<2x128xf32>
    %144 = arith.truncf %143 : vector<2x128xf32> to vector<2x128xbf16>
    %cst_19 = arith.constant dense<0.000000e+00> : vector<2x512xf32>
    %145 = tpu.matmul %144, %38, %cst_19 {dimension_numbers = #tpu.dot_dimension_numbers<[1], [0], [0], [1], [0, 0, 1, 1], [], []>} : vector<2x128xbf16>, vector<128x512xbf16>, vector<2x512xf32> -> vector<2x512xf32>
    %146 = vector.extract_strided_slice %9 {offsets = [6, 0, 0], sizes = [1, 2, 512], strides = [1, 1, 1]} : vector<8x2x512xf32> to vector<1x2x512xf32>
    %147 = vector.shape_cast %146 : vector<1x2x512xf32> to vector<2x512xf32>
    %148 = arith.addf %145, %147 : vector<2x512xf32>
    %149 = vector.extract_strided_slice %148 {offsets = [0, 0], sizes = [2, 384], strides = [1, 1]} : vector<2x512xf32> to vector<2x384xf32>
    %150 = arith.negf %149 : vector<2x384xf32>
    %151 = math.exp %150 : vector<2x384xf32>
    %cst_20 = arith.constant 1.000000e+00 : f32
    %152 = vector.broadcast %cst_20 : f32 to vector<2x384xf32>
    %153 = arith.addf %152, %151 : vector<2x384xf32>
    %154 = arith.divf %152, %153 : vector<2x384xf32>
    %155 = vector.extract_strided_slice %148 {offsets = [0, 384], sizes = [2, 128], strides = [1, 1]} : vector<2x512xf32> to vector<2x128xf32>
    %156 = math.tanh %155 : vector<2x128xf32>
    %157 = vector.extract_strided_slice %154 {offsets = [0, 0], sizes = [2, 128], strides = [1, 1]} : vector<2x384xf32> to vector<2x128xf32>
    %158 = vector.extract_strided_slice %154 {offsets = [0, 128], sizes = [2, 128], strides = [1, 1]} : vector<2x384xf32> to vector<2x128xf32>
    %159 = vector.extract_strided_slice %154 {offsets = [0, 256], sizes = [2, 128], strides = [1, 1]} : vector<2x384xf32> to vector<2x128xf32>
    %160 = arith.mulf %158, %141 : vector<2x128xf32>
    %161 = arith.mulf %157, %156 : vector<2x128xf32>
    %162 = arith.addf %160, %161 : vector<2x128xf32>
    %163 = math.tanh %162 : vector<2x128xf32>
    %164 = arith.mulf %159, %163 : vector<2x128xf32>
    %165 = arith.truncf %164 : vector<2x128xf32> to vector<2x128xbf16>
    %cst_21 = arith.constant dense<0.000000e+00> : vector<2x512xf32>
    %166 = tpu.matmul %165, %38, %cst_21 {dimension_numbers = #tpu.dot_dimension_numbers<[1], [0], [0], [1], [0, 0, 1, 1], [], []>} : vector<2x128xbf16>, vector<128x512xbf16>, vector<2x512xf32> -> vector<2x512xf32>
    %167 = vector.extract_strided_slice %9 {offsets = [7, 0, 0], sizes = [1, 2, 512], strides = [1, 1, 1]} : vector<8x2x512xf32> to vector<1x2x512xf32>
    %168 = vector.shape_cast %167 : vector<1x2x512xf32> to vector<2x512xf32>
    %169 = arith.addf %166, %168 : vector<2x512xf32>
    %170 = vector.extract_strided_slice %169 {offsets = [0, 0], sizes = [2, 384], strides = [1, 1]} : vector<2x512xf32> to vector<2x384xf32>
    %171 = arith.negf %170 : vector<2x384xf32>
    %172 = math.exp %171 : vector<2x384xf32>
    %cst_22 = arith.constant 1.000000e+00 : f32
    %173 = vector.broadcast %cst_22 : f32 to vector<2x384xf32>
    %174 = arith.addf %173, %172 : vector<2x384xf32>
    %175 = arith.divf %173, %174 : vector<2x384xf32>
    %176 = vector.extract_strided_slice %169 {offsets = [0, 384], sizes = [2, 128], strides = [1, 1]} : vector<2x512xf32> to vector<2x128xf32>
    %177 = math.tanh %176 : vector<2x128xf32>
    %178 = vector.extract_strided_slice %175 {offsets = [0, 0], sizes = [2, 128], strides = [1, 1]} : vector<2x384xf32> to vector<2x128xf32>
    %179 = vector.extract_strided_slice %175 {offsets = [0, 128], sizes = [2, 128], strides = [1, 1]} : vector<2x384xf32> to vector<2x128xf32>
    %180 = vector.extract_strided_slice %175 {offsets = [0, 256], sizes = [2, 128], strides = [1, 1]} : vector<2x384xf32> to vector<2x128xf32>
    %181 = arith.mulf %179, %162 : vector<2x128xf32>
    %182 = arith.mulf %178, %177 : vector<2x128xf32>
    %183 = arith.addf %181, %182 : vector<2x128xf32>
    %184 = math.tanh %183 : vector<2x128xf32>
    %185 = arith.mulf %180, %184 : vector<2x128xf32>
    %186 = arith.truncf %185 : vector<2x128xf32> to vector<2x128xbf16>
    %cst_23 = arith.constant dense<0.000000e+00> : vector<2x512xf32>
    %187 = tpu.matmul %186, %38, %cst_23 {dimension_numbers = #tpu.dot_dimension_numbers<[1], [0], [0], [1], [0, 0, 1, 1], [], []>} : vector<2x128xbf16>, vector<128x512xbf16>, vector<2x512xf32> -> vector<2x512xf32>
    %188 = vector.broadcast %1 : vector<1x512xf32> to vector<2x512xf32>
    %189 = arith.addf %187, %188 : vector<2x512xf32>
    %190 = vector.extract_strided_slice %189 {offsets = [0, 0], sizes = [2, 384], strides = [1, 1]} : vector<2x512xf32> to vector<2x384xf32>
    %191 = arith.negf %190 : vector<2x384xf32>
    %192 = math.exp %191 : vector<2x384xf32>
    %cst_24 = arith.constant 1.000000e+00 : f32
    %193 = vector.broadcast %cst_24 : f32 to vector<2x384xf32>
    %194 = arith.addf %193, %192 : vector<2x384xf32>
    %195 = arith.divf %193, %194 : vector<2x384xf32>
    %196 = vector.extract_strided_slice %189 {offsets = [0, 384], sizes = [2, 128], strides = [1, 1]} : vector<2x512xf32> to vector<2x128xf32>
    %197 = math.tanh %196 : vector<2x128xf32>
    %198 = vector.extract_strided_slice %195 {offsets = [0, 0], sizes = [2, 128], strides = [1, 1]} : vector<2x384xf32> to vector<2x128xf32>
    %199 = vector.extract_strided_slice %195 {offsets = [0, 128], sizes = [2, 128], strides = [1, 1]} : vector<2x384xf32> to vector<2x128xf32>
    %200 = vector.extract_strided_slice %195 {offsets = [0, 256], sizes = [2, 128], strides = [1, 1]} : vector<2x384xf32> to vector<2x128xf32>
    %201 = arith.mulf %199, %183 : vector<2x128xf32>
    %202 = arith.mulf %198, %197 : vector<2x128xf32>
    %203 = arith.addf %201, %202 : vector<2x128xf32>
    %204 = math.tanh %203 : vector<2x128xf32>
    %205 = arith.mulf %200, %204 : vector<2x128xf32>
    %c0_25 = arith.constant 0 : index
    %c0_26 = arith.constant 0 : index
    %206 = vector.load %arg4[%c0_25, %c0_26] : memref<1x128xf32, #tpu.memory_space<vmem>>, vector<1x128xf32>
    %207 = vector.broadcast %206 : vector<1x128xf32> to vector<2x128xf32>
    %208 = arith.mulf %205, %207 : vector<2x128xf32>
    %cst_27 = arith.constant dense<0.000000e+00> : vector<2xf32>
    %209 = vector.multi_reduction <add>, %208, %cst_27 [1] : vector<2x128xf32> to vector<2xf32>
    %210 = vector.shape_cast %209 : vector<2xf32> to vector<2x1xf32>
    %c0_28 = arith.constant 0 : index
    %c0_29 = arith.constant 0 : index
    %211 = vector.load %arg5[%c0_28, %c0_29] : memref<1x1xf32, #tpu.memory_space<vmem>>, vector<1x1xf32>
    %212 = vector.broadcast %211 : vector<1x1xf32> to vector<2x1xf32>
    %213 = arith.addf %210, %212 : vector<2x1xf32>
    %c0_30 = arith.constant 0 : index
    %c0_31 = arith.constant 0 : index
    %214 = vector.load %arg6[%c0_30, %c0_31] : memref<2x1xf32, #tpu.memory_space<vmem>>, vector<2x1xf32>
    tpu.vector_store %arg6[%c0_30, %c0_31], %213 {strides = array<i32>} : memref<2x1xf32, #tpu.memory_space<vmem>>, vector<2x1xf32>,
    return
  }
}

</mosaic_0001>

<bundles_post_ra>
// kernel: tpu_custom_call.1
= control target key start
LH: loop header
LB: loop body
LE: loop exit
PB: predicated region body
PF: predicated region fallthrough
CT: control target
= control target key end

     0   :  { %v2214_v0 = vmov 0   ;;  %s1605_s13 = smov [#allocation2]   ;;  %s2207_s0 = inlined_call_operand.vmem [shape: f32[8,2,1], index: 0, kind: input, shape index: {}]   ;;  %s2208_s5 = inlined_call_operand.<no memory space> [shape: f32[1,1], index: 5, kind: input, shape index: {}]   ;;  %s2209_s1 = inlined_call_operand.hbm [shape: bf16[128,512], index: 1, kind: input, shape index: {}]   ;;  %s2210_s4 = inlined_call_operand.vmem [shape: f32[1,128], index: 4, kind: input, shape index: {}]   ;;  %s2211_s6 = inlined_call_operand.vmem [shape: f32[2,1], index: 6, kind: output, shape index: {}]   ;;  %s2212_s2 = inlined_call_operand.vmem [shape: f32[1,512], index: 2, kind: input, shape index: {}]   ;;  %s2213_s3 = inlined_call_operand.vmem [shape: f32[1,512], index: 3, kind: input, shape index: {}]  }
   0x1   :  { %1372 = vset.pattern.permute.xlu0 %v2214_v0  ;;  %v37_v1 = vld [vmem:[%s2207_s0] sm:$0x3]  ;;  %1373 = vset.pattern.permute.xlu1 %v2214_v0  ;;  %v39_v2 = vld [vmem:[%s2207_s0 + $0x4] sm:$0x3]  ;;  %v38_v3 = vld [vmem:[%s2207_s0 + $0x2] sm:$0x3]  ;;  %v11_v9 = vstv %s2208_s5 }
   0x2   :  { %47 = vperm.xlu0 %1372, %v37_v1   ;;  %57 = vperm.xlu1 %1373, %v39_v2   ;;  %v40_v4 = vld [vmem:[%s2207_s0 + $0x6] sm:$0x3]  ;;  %v41_v5 = vld [vmem:[%s2207_s0 + $0x8] sm:$0x3]  ;;  %v42_v6 = vld [vmem:[%s2207_s0 + $0xa] sm:$0x3] }
   0x3   :  { %v43_v7 = vld [vmem:[%s2207_s0 + $0xc] sm:$0x3]  ;;  %v44_v8 = vld [vmem:[%s2207_s0 + $0xe] sm:$0x3]  ;;  %s31_s14 = sshll.u32 %s1605_s13, 4  ;;  %s32_s14 = int_to_ptr.vmem [resolvable:$true] %s31_s14 }
   0x4   :  { %12 = vst [vmem:[#allocation4] sm:$0x1] %v11_v9  ;;  %s1590_s17 = scalar_lea.vmem %s32_s14, 4096  ;;  %p1595_p1 = scmp.lt.s32.totalorder %s32_s14, %s32_s14 }
   0x5   :  { %p1591_p0 = scmp.ne.s32.totalorder %s32_s14, %s1590_s17  ;;  %p1596_p2 = scmp.lt.s32.totalorder %s1590_s17, %s1590_s17 }
   0x6   :  { %52 = vperm.xlu0 %1372, %v38_v3   ;;  %62 = vperm.xlu1 %1373, %v40_v4  }
   0x7   :  { %p1597_p3 = por %p1596_p2, %p1595_p1 }
   0x9   :  { %p1598_p4 = pnand %p1597_p3, %p1591_p0 }
   0xa   :  { %67 = vperm.xlu0 %1372, %v41_v5   ;;  %72 = vperm.xlu1 %1373, %v42_v6  }
   0xe   :  { %77 = vperm.xlu0 %1372, %v43_v7   ;;  %82 = vperm.xlu1 %1373, %v44_v8  }
   0xf   :  { %1601 = shalt.err (!%p1598_p4)  }
  0x10   :  { %34 = dma.hbm_to_vmem [thread:$0]  %s2209_s1, 4096, %s32_s14, [#allocation3]  ;;  %v86_v10 = vlaneseq  ;;  %v35_v14 = vld [vmem:[%s2212_s2] sm:$0xf] }
  0x11   :  { %v36_v15 = vld [vmem:[%s2213_s3] sm:$0xf] }
  0x12   :  { %v87_v11 = vshrl.u32 %v86_v10, 7 }
  0x14   :  { %v88_v12 = vsub.s32 0, %v87_v11  ;;  %v92_v13 = vsub.s32 1, %v87_v11  ;;  %v96_v16 = vsub.s32 2, %v87_v11  ;;  %v100_v17 = vsub.s32 3, %v87_v11 }
  0x16   :  { %v1681_v18 = vrot.slane %v35_v14, %v88_v12  ;;  %v1683_v19 = vrot.slane %v35_v14, %v92_v13  ;;  %v1685_v20 = vrot.slane %v36_v15, %v88_v12  ;;  %v1687_v21 = vrot.slane %v36_v15, %v92_v13 }
  0x17   :  { %v1689_v22 = vrot.slane %v35_v14, %v96_v16  ;;  %v1691_v23 = vrot.slane %v35_v14, %v100_v17  ;;  %v1693_v25 = vrot.slane %v36_v15, %v96_v16  ;;  %v1695_v26 = vrot.slane %v36_v15, %v100_v17 }
  0x18   :  { %2220 = vst [vmem:[#allocation10_spill] sm:$0xff] %v1685_v20  ;;  %2221 = vst [vmem:[#allocation11_spill] sm:$0xff] %v1687_v21 }
  0x19   :  { %2222 = vst [vmem:[#allocation12_spill] sm:$0xff] %v1693_v25  ;;  %2223 = vst [vmem:[#allocation13_spill] sm:$0xff] %v1695_v26 }
  0x7d   :  { %v48_v24 = vpop.permute.xlu0 %47  ;;  %v58_v29 = vpop.permute.xlu1 %57 }
  0x7e   :  { %v106_v27 = vmul.f32 %v1681_v18, %v48_v24  ;;  %v107_v28 = vmul.f32 %v1683_v19, %v48_v24  ;;  %v114_v30 = vmul.f32 %v1681_v18, %v58_v29  ;;  %v115_v31 = vmul.f32 %v1683_v19, %v58_v29 }
  0x7f   :  { %v116_v32 = vmul.f32 %v1689_v22, %v58_v29  ;;  %v117_v33 = vmul.f32 %v1691_v23, %v58_v29  ;;  %v108_v41 = vmul.f32 %v1689_v22, %v48_v24  ;;  %v109_v42 = vmul.f32 %v1691_v23, %v48_v24 }
  0x80   :  { %v159_v34 = vadd.f32 %v1685_v20, %v106_v27  ;;  %v160_v35 = vadd.f32 %v1687_v21, %v107_v28  ;;  %v1706_v37 = vadd.f32 %v1685_v20, %v114_v30  ;;  %v1709_v38 = vadd.f32 %v1687_v21, %v115_v31 }
  0x81   :  { %v53_v36 = vpop.permute.xlu0 %52  ;;  %v1712_v39 = vadd.f32 %v1693_v25, %v116_v32  ;;  %v1715_v40 = vadd.f32 %v1695_v26, %v117_v33  ;;  %v63_v45 = vpop.permute.xlu1 %62  ;;  %v161_v57 = vadd.f32 %v1693_v25, %v108_v41 }
  0x82   :  { %v1307_v43 = vmul.f32 -1.442695, %v159_v34  ;;  %v1308_v44 = vmul.f32 -1.442695, %v160_v35  ;;  %v110_v46 = vmul.f32 %v1681_v18, %v53_v36  ;;  %v111_v47 = vmul.f32 %v1683_v19, %v53_v36 }
  0x83   :  { %v112_v48 = vmul.f32 %v1689_v22, %v53_v36  ;;  %v113_v49 = vmul.f32 %v1691_v23, %v53_v36  ;;  %v118_v50 = vmul.f32 %v1681_v18, %v63_v45  ;;  %v119_v51 = vmul.f32 %v1683_v19, %v63_v45 }
  0x84   :  { %1374 = vpow2.f32 %v1307_v43  ;;  %v120_v52 = vmul.f32 %v1689_v22, %v63_v45  ;;  %v1727_v53 = vadd.f32 %v1685_v20, %v110_v46  ;;  %v1730_v54 = vadd.f32 %v1687_v21, %v111_v47 }
  0x85   :  { %1376 = vpow2.f32 %v1308_v44  ;;  %v1733_v55 = vadd.f32 %v1693_v25, %v112_v48  ;;  %v68_v56 = vpop.permute.xlu0 %67  ;;  %v1737_v58 = vadd.f32 %v1695_v26, %v113_v49  ;;  %v73_v61 = vpop.permute.xlu1 %72  ;;  %v121_v1 = vmul.f32 %v1691_v23, %v63_v45 }
  0x86   :  { %v122_v59 = vmul.f32 %v1681_v18, %v68_v56  ;;  %v123_v60 = vmul.f32 %v1683_v19, %v68_v56  ;;  %v124_v62 = vmul.f32 %v1689_v22, %v68_v56  ;;  %v125_v63 = vmul.f32 %v1691_v23, %v68_v56 }
  0x87   :  { %v1745_v2 = vadd.f32 %v1685_v20, %v118_v50  ;;  %v1754_v5 = vadd.f32 %v1687_v21, %v119_v51  ;;  %v1757_v6 = vadd.f32 %v1693_v25, %v120_v52  ;;  %v1766_v11 = vadd.f32 %v1695_v26, %v121_v1 }
  0x88   :  { %v1748_v3 = vadd.f32 %v1685_v20, %v122_v59  ;;  %v1751_v4 = vadd.f32 %v1687_v21, %v123_v60  ;;  %v1760_v7 = vadd.f32 %v1693_v25, %v124_v62  ;;  %v1763_v8 = vadd.f32 %v1695_v26, %v125_v63 }
  0x89   :  { %v78_v9 = vpop.permute.xlu0 %77  ;;  %v126_v12 = vmul.f32 %v1681_v18, %v73_v61  ;;  %v83_v17 = vpop.permute.xlu1 %82  ;;  %v127_v24 = vmul.f32 %v1683_v19, %v73_v61  ;;  %v128_v27 = vmul.f32 %v1689_v22, %v73_v61  ;;  %v129_v28 = vmul.f32 %v1691_v23, %v73_v61 }
  0x8a   :  { %2224 = vst [vmem:[#allocation14_spill] sm:$0xff] %v1760_v7  ;;  %2225 = vst [vmem:[#allocation15_spill] sm:$0xff] %v1763_v8  ;;  %v130_v13 = vmul.f32 %v1681_v18, %v78_v9  ;;  %v131_v14 = vmul.f32 %v1683_v19, %v78_v9  ;;  %v132_v15 = vmul.f32 %v1689_v22, %v78_v9  ;;  %v1309_v43 = vmul.f32 -1.442695, %v161_v57 }
  0x8b   :  { %v133_v16 = vmul.f32 %v1691_v23, %v78_v9  ;;  %v1777_v29 = vadd.f32 %v1685_v20, %v126_v12  ;;  %v1792_v34 = vadd.f32 %v1687_v21, %v127_v24  ;;  %v1795_v35 = vadd.f32 %v1693_v25, %v128_v27 }
  0x8c   :  { %v1780_v30 = vadd.f32 %v1685_v20, %v130_v13  ;;  %v1783_v31 = vadd.f32 %v1687_v21, %v131_v14  ;;  %v1786_v32 = vadd.f32 %v1693_v25, %v132_v15  ;;  %v1798_v36 = vadd.f32 %v1695_v26, %v129_v28 }
  0x8d   :  { %2226 = vst [vmem:[#allocation16_spill] sm:$0xff] %v1777_v29  ;;  %v1789_v33 = vadd.f32 %v1695_v26, %v133_v16  ;;  %2231 = vst [vmem:[#allocation21_spill] sm:$0xff] %v1792_v34  ;;  %v134_v41 = vmul.f32 %v1681_v18, %v83_v17  ;;  %v135_v44 = vmul.f32 %v1683_v19, %v83_v17  ;;  %1378 = vpow2.f32 %v1309_v43 }
  0x8e   :  { %2227 = vst [vmem:[#allocation17_spill] sm:$0xff] %v1780_v30  ;;  %2228 = vst [vmem:[#allocation18_spill] sm:$0xff] %v1783_v31  ;;  %v136_v45 = vmul.f32 %v1689_v22, %v83_v17  ;;  %v137_v46 = vmul.f32 %v1691_v23, %v83_v17  ;;  %v162_v47 = vadd.f32 %v1695_v26, %v109_v42  ;;  %v192_v23 = vand.u32 127, %v86_v10 }
  0x8f   :  { %2229 = vst [vmem:[#allocation19_spill] sm:$0xff] %v1786_v32  ;;  %2230 = vst [vmem:[#allocation20_spill] sm:$0xff] %v1789_v33  ;;  %v1806_v48 = vadd.f32 %v1685_v20, %v134_v41  ;;  %v1809_v49 = vadd.f32 %v1687_v21, %v135_v44  ;;  %v1606_v63 = vmov 0.0  }
  0x90   :  { %2232 = vst [vmem:[#allocation22_spill] sm:$0xff] %v1795_v35  ;;  %2233 = vst [vmem:[#allocation23_spill] sm:$0xff] %v1798_v36  ;;  %v1812_v50 = vadd.f32 %v1693_v25, %v136_v45  ;;  %v1815_v18 = vadd.f32 %v1695_v26, %v137_v46  ;;  %1380 = vtanh.f32 %v162_v47  ;;  %vm193_vm0 = vcmp.lt.s32.totalorder %v192_v23, 64 }
  0x91   :  { %2234 = vst [vmem:[#allocation24_spill] sm:$0xff] %v1806_v48  ;;  %2235 = vst [vmem:[#allocation25_spill] sm:$0xff] %v1809_v49  ;;  %v1375_v51 = vpop.eup %1374  ;;  %v1306_v1 = vsel %vm193_vm0, 1.0, %v1606_v63 }
  0x92   :  { %2236 = vst [vmem:[#allocation26_spill] sm:$0xff] %v1812_v50  ;;  %2237 = vst [vmem:[#allocation27_spill] sm:$0xff] %v1815_v18  ;;  %v1377_v19 = vpop.eup %1376  ;;  %v205_v22 = vadd.f32 1.0, %v1375_v51 }
  0x93   :  { %v206_v52 = vadd.f32 1.0, %v1377_v19 }
  0x94   :  { %1382 = vrcp.f32 %v205_v22 }
  0x95   :  { %1384 = vrcp.f32 %v206_v52 }
  0x9a   :  { %v1379_v42 = vpop.eup %1378 }
  0x9b   :  { %v207_v60 = vadd.f32 1.0, %v1379_v42 }
  0x9d   :  { %v1381_v56 = vpop.eup %1380  ;;  %1386 = vrcp.f32 %v207_v60 }
  0xa1   :  { %v1383_v57 = vpop.eup %1382 }
  0xa2   :  { %v1385_v59 = vpop.eup %1384  ;;  %v216_v61 = vmul.f32 %v1383_v57, %v1381_v56 }
  0xa3   :  { %v215_v62 = vmul.f32 0.0, %v1385_v59 }
  0xa5   :  { %v217_v9 = vadd.f32 %v216_v61, %v215_v62 }
  0xa7   :  { %1388 = vtanh.f32 %v217_v9  ;;  %v1818_v12 = vmul.f32 %v1306_v1, %v217_v9 }
  0xaa   :  { %v1387_v13 = vpop.eup %1386 }
  0xb4   :  { %v1389_v14 = vpop.eup %1388 }
  0xb5   :  { %v219_v15 = vmul.f32 %v1389_v14, %v1387_v13 }
  0xb7   :  { %v1820_v16 = vmul.f32 %v1306_v1, %v219_v15 }
  0xb8   :  { %1602 = dma.done.wait [#allocation3], 4096 }
  0xb9   :  { %1603 = vsyncadd [#allocation3], 4294963200  ;;  %451 = vmatprep.mubr.bf16.mxu0 %v2214_v0  ;;  %492 = vmatprep.mubr.bf16.mxu1 %v2214_v0  ;;  %v1824_v10 = vld [vmem:[#allocation2 + $0xe4] ss:$16 sps:$4 sm:$0xff]   ;;  %v1826_v17 = vld [vmem:[#allocation2 + $0xe0] ss:$16 sps:$4 sm:$0xff]   ;;  %v258_v25 = vpack.c.bf16 %v1820_v16, %v1820_v16 }
  0xba   :  { %419 = vmatprep.subr.bf16.mxu0 %v1824_v10  ;;  %v1829_v24 = vld [vmem:[#allocation2 + $0xc4] ss:$16 sps:$4 sm:$0xff]   ;;  %v1832_v27 = vld [vmem:[#allocation2 + $0xc0] ss:$16 sps:$4 sm:$0xff]   ;;  %v1837_v41 = vld [vmem:[#allocation2 + $0xec] ss:$16 sps:$4 sm:$0xff]  }
  0xbb   :  { %420 = vmatpush1.bf16.msra.mxu0 %v1826_v17  ;;  %v1835_v28 = vld [vmem:[#allocation2 + $0xa4] ss:$16 sps:$4 sm:$0xff]   ;;  %v1839_v43 = vld [vmem:[#allocation2 + $0xe8] ss:$16 sps:$4 sm:$0xff]   ;;  %v1842_v44 = vld [vmem:[#allocation2 + $0xa0] ss:$16 sps:$4 sm:$0xff]   ;;  %460 = vmatprep.subr.bf16.mxu1 %v1837_v41 }
  0xbc   :  { %421 = vmatprep.subr.bf16.mxu0 %v1829_v24  ;;  %v1846_v45 = vld [vmem:[#allocation2 + $0x84] ss:$16 sps:$4 sm:$0xff]   ;;  %461 = vmatpush1.bf16.msra.mxu1 %v1839_v43  ;;  %v1849_v46 = vld [vmem:[#allocation2 + $0xcc] ss:$16 sps:$4 sm:$0xff]   ;;  %v1851_v47 = vld [vmem:[#allocation2 + $0xc8] ss:$16 sps:$4 sm:$0xff]  }
  0xbd   :  { %462 = vmatprep.subr.bf16.mxu1 %v1849_v46  ;;  %v1855_v51 = vld [vmem:[#allocation2 + $0x80] ss:$16 sps:$4 sm:$0xff]   ;;  %v1857_v19 = vld [vmem:[#allocation2 + $0x64] ss:$16 sps:$4 sm:$0xff]   ;;  %v1859_v22 = vld [vmem:[#allocation2 + $0xac] ss:$16 sps:$4 sm:$0xff]  }
  0xbe   :  { %v1863_v52 = vld [vmem:[#allocation2 + $0xa8] ss:$16 sps:$4 sm:$0xff]   ;;  %v1866_v23 = vld [vmem:[#allocation2 + $0x8c] ss:$16 sps:$4 sm:$0xff]   ;;  %v1869_v42 = vld [vmem:[#allocation2 + $0x60] ss:$16 sps:$4 sm:$0xff]  }
  0xbf   :  { %422 = vmatpush1.bf16.msra.mxu0 %v1832_v27  ;;  %v1872_v56 = vld [vmem:[#allocation2 + $0x44] ss:$16 sps:$4 sm:$0xff]   ;;  %v1875_v57 = vld [vmem:[#allocation2 + $0x88] ss:$16 sps:$4 sm:$0xff]   ;;  %v1878_v59 = vld [vmem:[#allocation2 + $0x6c] ss:$16 sps:$4 sm:$0xff]  }
  0xc0   :  { %423 = vmatprep.subr.bf16.mxu0 %v1835_v28  ;;  %463 = vmatpush1.bf16.msra.mxu1 %v1851_v47  ;;  %v1881_v60 = vld [vmem:[#allocation2 + $0x40] ss:$16 sps:$4 sm:$0xff]   ;;  %v1883_v61 = vld [vmem:[#allocation2 + $0x24] ss:$16 sps:$4 sm:$0xff]   ;;  %v1887_v62 = vld [vmem:[#allocation2 + $0x68] ss:$16 sps:$4 sm:$0xff]  }
  0xc1   :  { %464 = vmatprep.subr.bf16.mxu1 %v1859_v22  ;;  %v1890_v63 = vld [vmem:[#allocation2 + $0x4c] ss:$16 sps:$4 sm:$0xff]   ;;  %v1893_v1 = vld [vmem:[#allocation2 + $0x20] ss:$16 sps:$4 sm:$0xff]   ;;  %v1896_v9 = vld [vmem:[#allocation2 + $0x4] ss:$16 sps:$4 sm:$0xff]  }
  0xc2   :  { %v1899_v13 = vld [vmem:[#allocation2 + $0x48] ss:$16 sps:$4 sm:$0xff]   ;;  %v1902_v14 = vld [vmem:[#allocation2 + $0x2c] ss:$16 sps:$4 sm:$0xff]   ;;  %v1905_v15 = vld [vmem:[#allocation2] ss:$16 sps:$4 sm:$0xff]  }
  0xc3   :  { %424 = vmatpush1.bf16.msra.mxu0 %v1842_v44  ;;  %v1909_v0 = vld [vmem:[#allocation2 + $0x28] ss:$16 sps:$4 sm:$0xff]   ;;  %v1912_v26 = vld [vmem:[#allocation2 + $0xc] ss:$16 sps:$4 sm:$0xff]   ;;  %v2238_v20 = vmov 0   ;;  %vm1282_vm1 = vcmask 1041408  }
  0xc4   :  { %425 = vmatprep.subr.bf16.mxu0 %v1846_v45  ;;  %465 = vmatpush1.bf16.msra.mxu1 %v1863_v52  ;;  %v1918_v21 = vld [vmem:[#allocation2 + $0x8] ss:$16 sps:$4 sm:$0xff]   ;;  %vm1294_vm2 = vcmask 1024  }
  0xc5   :  { %466 = vmatprep.subr.bf16.mxu1 %v1866_v23 }
  0xc7   :  { %426 = vmatpush1.bf16.msra.mxu0 %v1855_v51 }
  0xc8   :  { %427 = vmatprep.subr.bf16.mxu0 %v1857_v19  ;;  %467 = vmatpush1.bf16.msra.mxu1 %v1875_v57 }
  0xc9   :  { %468 = vmatprep.subr.bf16.mxu1 %v1878_v59 }
  0xcb   :  { %428 = vmatpush1.bf16.msra.mxu0 %v1869_v42 }
  0xcc   :  { %429 = vmatprep.subr.bf16.mxu0 %v1872_v56  ;;  %469 = vmatpush1.bf16.msra.mxu1 %v1887_v62 }
  0xcd   :  { %470 = vmatprep.subr.bf16.mxu1 %v1890_v63 }
  0xcf   :  { %430 = vmatpush1.bf16.msra.mxu0 %v1881_v60 }
  0xd0   :  { %431 = vmatprep.subr.bf16.mxu0 %v1883_v61  ;;  %471 = vmatpush1.bf16.msra.mxu1 %v1899_v13 }
  0xd1   :  { %472 = vmatprep.subr.bf16.mxu1 %v1902_v14 }
  0xd3   :  { %432 = vmatpush1.bf16.msra.mxu0 %v1893_v1 }
  0xd4   :  { %433 = vmatprep.subr.bf16.mxu0 %v1896_v9  ;;  %473 = vmatpush1.bf16.msra.mxu1 %v1909_v0 }
  0xd5   :  { %474 = vmatprep.subr.bf16.mxu1 %v1912_v26 }
  0xd7   :  { %434 = vmatpush1.bf16.msra.mxu0 %v1905_v15 }
  0xd8   :  { %526 = vmatprep.subr.bf16.mxu0 %v1824_v10  ;;  %475 = vmatpush1.bf16.msra.mxu1 %v1918_v21 }
  0xd9   :  { %567 = vmatprep.subr.bf16.mxu1 %v1837_v41 }
  0xda   :  { %452 = vmatmul.mubr.bf16.vlgmr.msra.gmra.mxu0 %v258_v25 }
  0xdb   :  { %527 = vmatpush1.bf16.msra.mxu0 %v1826_v17  ;;  %558 = vmatprep.mubr.bf16.mxu0 %v2238_v20 }
  0xdc   :  { %528 = vmatprep.subr.bf16.mxu0 %v1829_v24  ;;  %493 = vmatmul.mubr.bf16.vlgmr.msra.gmra.mxu1 %v258_v25 }
  0xdd   :  { %568 = vmatpush1.bf16.msra.mxu1 %v1839_v43  ;;  %599 = vmatprep.mubr.bf16.mxu1 %v2238_v20 }
  0xde   :  { %569 = vmatprep.subr.bf16.mxu1 %v1849_v46 }
  0xdf   :  { %529 = vmatpush1.bf16.msra.mxu0 %v1832_v27 }
  0xe0   :  { %530 = vmatprep.subr.bf16.mxu0 %v1835_v28 }
  0xe1   :  { %570 = vmatpush1.bf16.msra.mxu1 %v1851_v47 }
  0xe2   :  { %571 = vmatprep.subr.bf16.mxu1 %v1859_v22 }
  0xe3   :  { %531 = vmatpush1.bf16.msra.mxu0 %v1842_v44 }
  0xe4   :  { %532 = vmatprep.subr.bf16.mxu0 %v1846_v45 }
  0xe5   :  { %572 = vmatpush1.bf16.msra.mxu1 %v1863_v52 }
  0xe6   :  { %573 = vmatprep.subr.bf16.mxu1 %v1866_v23 }
  0xe7   :  { %533 = vmatpush1.bf16.msra.mxu0 %v1855_v51 }
  0xe8   :  { %534 = vmatprep.subr.bf16.mxu0 %v1857_v19 }
  0xe9   :  { %574 = vmatpush1.bf16.msra.mxu1 %v1875_v57 }
  0xea   :  { %575 = vmatprep.subr.bf16.mxu1 %v1878_v59 }
  0xeb   :  { %535 = vmatpush1.bf16.msra.mxu0 %v1869_v42 }
  0xec   :  { %536 = vmatprep.subr.bf16.mxu0 %v1872_v56 }
  0xed   :  { %576 = vmatpush1.bf16.msra.mxu1 %v1887_v62 }
  0xee   :  { %577 = vmatprep.subr.bf16.mxu1 %v1890_v63 }
  0xef   :  { %537 = vmatpush1.bf16.msra.mxu0 %v1881_v60 }
  0xf0   :  { %538 = vmatprep.subr.bf16.mxu0 %v1883_v61 }
  0xf1   :  { %578 = vmatpush1.bf16.msra.mxu1 %v1899_v13 }
  0xf2   :  { %579 = vmatprep.subr.bf16.mxu1 %v1902_v14 }
  0xf3   :  { %539 = vmatpush1.bf16.msra.mxu0 %v1893_v1 }
  0xf4   :  { %540 = vmatprep.subr.bf16.mxu0 %v1896_v9 }
  0xf5   :  { %580 = vmatpush1.bf16.msra.mxu1 %v1909_v0 }
  0xf6   :  { %581 = vmatprep.subr.bf16.mxu1 %v1912_v26 }
  0xf7   :  { %541 = vmatpush1.bf16.msra.mxu0 %v1905_v15 }
  0xf8   :  { %633 = vmatprep.subr.bf16.mxu0 %v1824_v10 }
  0xf9   :  { %582 = vmatpush1.bf16.msra.mxu1 %v1918_v21 }
  0xfa   :  { %674 = vmatprep.subr.bf16.mxu1 %v1837_v41 }
 0x19a   :  { %v453_v25 = vpop.f32.mrf.mxu0 }
 0x19b   :  { %v454_v16 = vadd.f32 %v453_v25, %v1727_v53 }
 0x19c   :  { %v455_v18 = vpop.f32.mrf.mxu0  ;;  %v494_v32 = vpop.f32.mrf.mxu1 }
 0x19d   :  { %v1342_v50 = vmul.f32 -1.442695, %v454_v16  ;;  %v456_v49 = vadd.f32 %v455_v18, %v1730_v54  ;;  %v495_v35 = vadd.f32 %v494_v32, %v1733_v55 }
 0x19e   :  { %v457_v48 = vpop.f32.mrf.mxu0  ;;  %v496_v30 = vpop.f32.mrf.mxu1 }
 0x19f   :  { %1438 = vpow2.f32 %v1342_v50  ;;  %v1343_v33 = vmul.f32 -1.442695, %v456_v49  ;;  %v1344_v29 = vmul.f32 -1.442695, %v495_v35  ;;  %v497_v8 = vadd.f32 %v496_v30, %v1737_v58 }
 0x1a0   :  { %v458_v31 = vpop.f32.mrf.mxu0  ;;  %v498_v36 = vpop.f32.mrf.mxu1 }
 0x1a1   :  { %1440 = vpow2.f32 %v1343_v33 }
 0x1a2   :  { %v499_v34 = vpop.f32.mrf.mxu1  ;;  %1442 = vpow2.f32 %v1344_v29 }
 0x1a3   :  { %1444 = vtanh.f32 %v497_v8 }
 0x1ac   :  { %v1439_v7 = vpop.eup %1438 }
 0x1ad   :  { %v510_v53 = vadd.f32 1.0, %v1439_v7 }
 0x1ae   :  { %v1441_v25 = vpop.eup %1440 }
 0x1af   :  { %1446 = vrcp.f32 %v510_v53  ;;  %v511_v54 = vadd.f32 1.0, %v1441_v25  ;;  %v1443_v48 = vpop.eup %1442 }
 0x1b0   :  { %v1445_v49 = vpop.eup %1444  ;;  %v512_v50 = vadd.f32 1.0, %v1443_v48 }
 0x1b1   :  { %1448 = vrcp.f32 %v511_v54 }
 0x1b2   :  { %1450 = vrcp.f32 %v512_v50 }
 0x1bc   :  { %v1447_v31 = vpop.eup %1446 }
 0x1bd   :  { %v521_v55 = vmul.f32 %v1447_v31, %v1445_v49 }
 0x1be   :  { %v1449_v33 = vpop.eup %1448 }
 0x1bf   :  { %v520_v36 = vmul.f32 %v1449_v33, %v1818_v12  ;;  %v1451_v58 = vpop.eup %1450 }
 0x1c1   :  { %v1963_v32 = vadd.f32 %v521_v55, %v520_v36 }
 0x1c3   :  { %1452 = vtanh.f32 %v1963_v32 }
 0x1d0   :  { %v1453_v7 = vpop.eup %1452 }
 0x1d1   :  { %v524_v29 = vmul.f32 %v1453_v7, %v1451_v58 }
 0x1d3   :  { %v525_v8 = vpack.c.bf16 %v524_v29, %v524_v29 }
 0x1d5   :  { %559 = vmatmul.mubr.bf16.vlgmr.msra.gmra.mxu0 %v525_v8  ;;  %600 = vmatmul.mubr.bf16.vlgmr.msra.gmra.mxu1 %v525_v8 }
 0x1d6   :  { %634 = vmatpush1.bf16.msra.mxu0 %v1826_v17  ;;  %675 = vmatpush1.bf16.msra.mxu1 %v1839_v43 }
 0x1d7   :  { %635 = vmatprep.subr.bf16.mxu0 %v1829_v24  ;;  %676 = vmatprep.subr.bf16.mxu1 %v1849_v46 }
 0x1d8   :  { %665 = vmatprep.mubr.bf16.mxu0 %v2238_v20  ;;  %706 = vmatprep.mubr.bf16.mxu1 %v2238_v20 }
 0x1da   :  { %636 = vmatpush1.bf16.msra.mxu0 %v1832_v27  ;;  %677 = vmatpush1.bf16.msra.mxu1 %v1851_v47 }
 0x1db   :  { %637 = vmatprep.subr.bf16.mxu0 %v1835_v28  ;;  %678 = vmatprep.subr.bf16.mxu1 %v1859_v22 }
 0x1de   :  { %638 = vmatpush1.bf16.msra.mxu0 %v1842_v44  ;;  %679 = vmatpush1.bf16.msra.mxu1 %v1863_v52 }
 0x1df   :  { %639 = vmatprep.subr.bf16.mxu0 %v1846_v45  ;;  %680 = vmatprep.subr.bf16.mxu1 %v1866_v23 }
 0x1e2   :  { %640 = vmatpush1.bf16.msra.mxu0 %v1855_v51  ;;  %681 = vmatpush1.bf16.msra.mxu1 %v1875_v57 }
 0x1e3   :  { %641 = vmatprep.subr.bf16.mxu0 %v1857_v19  ;;  %682 = vmatprep.subr.bf16.mxu1 %v1878_v59 }
 0x1e6   :  { %642 = vmatpush1.bf16.msra.mxu0 %v1869_v42  ;;  %683 = vmatpush1.bf16.msra.mxu1 %v1887_v62 }
 0x1e7   :  { %643 = vmatprep.subr.bf16.mxu0 %v1872_v56  ;;  %684 = vmatprep.subr.bf16.mxu1 %v1890_v63 }
 0x1ea   :  { %644 = vmatpush1.bf16.msra.mxu0 %v1881_v60  ;;  %685 = vmatpush1.bf16.msra.mxu1 %v1899_v13 }
 0x1eb   :  { %645 = vmatprep.subr.bf16.mxu0 %v1883_v61  ;;  %686 = vmatprep.subr.bf16.mxu1 %v1902_v14 }
 0x1ee   :  { %646 = vmatpush1.bf16.msra.mxu0 %v1893_v1  ;;  %687 = vmatpush1.bf16.msra.mxu1 %v1909_v0 }
 0x1ef   :  { %647 = vmatprep.subr.bf16.mxu0 %v1896_v9  ;;  %688 = vmatprep.subr.bf16.mxu1 %v1912_v26 }
 0x1f2   :  { %648 = vmatpush1.bf16.msra.mxu0 %v1905_v15  ;;  %689 = vmatpush1.bf16.msra.mxu1 %v1918_v21 }
 0x1f3   :  { %740 = vmatprep.subr.bf16.mxu0 %v1824_v10  ;;  %781 = vmatprep.subr.bf16.mxu1 %v1837_v41 }
 0x295   :  { %v560_v30 = vpop.f32.mrf.mxu0  ;;  %v601_v34 = vpop.f32.mrf.mxu1 }
 0x296   :  { %v561_v35 = vadd.f32 %v560_v30, %v1706_v37  ;;  %v602_v33 = vadd.f32 %v601_v34, %v1712_v39 }
 0x297   :  { %v562_v18 = vpop.f32.mrf.mxu0  ;;  %v603_v12 = vpop.f32.mrf.mxu1 }
 0x298   :  { %v1345_v16 = vmul.f32 -1.442695, %v561_v35  ;;  %v563_v53 = vadd.f32 %v562_v18, %v1709_v38  ;;  %v1347_v50 = vmul.f32 -1.442695, %v602_v33  ;;  %v604_v55 = vadd.f32 %v603_v12, %v1715_v40 }
 0x299   :  { %v564_v25 = vpop.f32.mrf.mxu0  ;;  %v605_v54 = vpop.f32.mrf.mxu1 }
 0x29a   :  { %1454 = vpow2.f32 %v1345_v16  ;;  %v1346_v48 = vmul.f32 -1.442695, %v563_v53 }
 0x29b   :  { %v565_v49 = vpop.f32.mrf.mxu0  ;;  %v606_v31 = vpop.f32.mrf.mxu1 }
 0x29c   :  { %1456 = vpow2.f32 %v1346_v48 }
 0x29d   :  { %1458 = vpow2.f32 %v1347_v50 }
 0x2a7   :  { %v1455_v36 = vpop.eup %1454 }
 0x2a8   :  { %v617_v58 = vadd.f32 1.0, %v1455_v36 }
 0x2a9   :  { %v1457_v37 = vpop.eup %1456 }
 0x2aa   :  { %1460 = vrcp.f32 %v617_v58  ;;  %v618_v7 = vadd.f32 1.0, %v1457_v37  ;;  %v1459_v38 = vpop.eup %1458 }
 0x2ab   :  { %1462 = vtanh.f32 %v604_v55  ;;  %v619_v35 = vadd.f32 1.0, %v1459_v38 }
 0x2ac   :  { %1464 = vrcp.f32 %v618_v7 }
 0x2ad   :  { %1466 = vrcp.f32 %v619_v35 }
 0x2b7   :  { %v1461_v29 = vpop.eup %1460 }
 0x2b8   :  { %v1463_v8 = vpop.eup %1462 }
 0x2b9   :  { %v1465_v30 = vpop.eup %1464  ;;  %v628_v16 = vmul.f32 %v1463_v8, %v1461_v29 }
 0x2ba   :  { %v627_v18 = vmul.f32 %v1465_v30, %v1963_v32  ;;  %v1467_v40 = vpop.eup %1466 }
 0x2bc   :  { %v2005_v39 = vadd.f32 %v628_v16, %v627_v18 }
 0x2be   :  { %1468 = vtanh.f32 %v2005_v39 }
 0x2cb   :  { %v1469_v34 = vpop.eup %1468 }
 0x2cc   :  { %v631_v12 = vmul.f32 %v1469_v34, %v1467_v40 }
 0x2ce   :  { %v632_v53 = vpack.c.bf16 %v631_v12, %v631_v12 }
 0x2d0   :  { %666 = vmatmul.mubr.bf16.vlgmr.msra.gmra.mxu0 %v632_v53  ;;  %707 = vmatmul.mubr.bf16.vlgmr.msra.gmra.mxu1 %v632_v53 }
 0x2d1   :  { %741 = vmatpush1.bf16.msra.mxu0 %v1826_v17  ;;  %782 = vmatpush1.bf16.msra.mxu1 %v1839_v43 }
 0x2d2   :  { %742 = vmatprep.subr.bf16.mxu0 %v1829_v24  ;;  %783 = vmatprep.subr.bf16.mxu1 %v1849_v46 }
 0x2d3   :  { %772 = vmatprep.mubr.bf16.mxu0 %v2238_v20  ;;  %813 = vmatprep.mubr.bf16.mxu1 %v2238_v20 }
 0x2d5   :  { %743 = vmatpush1.bf16.msra.mxu0 %v1832_v27  ;;  %784 = vmatpush1.bf16.msra.mxu1 %v1851_v47 }
 0x2d6   :  { %744 = vmatprep.subr.bf16.mxu0 %v1835_v28  ;;  %785 = vmatprep.subr.bf16.mxu1 %v1859_v22 }
 0x2d9   :  { %745 = vmatpush1.bf16.msra.mxu0 %v1842_v44  ;;  %786 = vmatpush1.bf16.msra.mxu1 %v1863_v52 }
 0x2da   :  { %746 = vmatprep.subr.bf16.mxu0 %v1846_v45  ;;  %787 = vmatprep.subr.bf16.mxu1 %v1866_v23 }
 0x2dd   :  { %747 = vmatpush1.bf16.msra.mxu0 %v1855_v51  ;;  %788 = vmatpush1.bf16.msra.mxu1 %v1875_v57 }
 0x2de   :  { %748 = vmatprep.subr.bf16.mxu0 %v1857_v19  ;;  %789 = vmatprep.subr.bf16.mxu1 %v1878_v59 }
 0x2e1   :  { %749 = vmatpush1.bf16.msra.mxu0 %v1869_v42  ;;  %790 = vmatpush1.bf16.msra.mxu1 %v1887_v62 }
 0x2e2   :  { %750 = vmatprep.subr.bf16.mxu0 %v1872_v56  ;;  %791 = vmatprep.subr.bf16.mxu1 %v1890_v63 }
 0x2e5   :  { %751 = vmatpush1.bf16.msra.mxu0 %v1881_v60  ;;  %792 = vmatpush1.bf16.msra.mxu1 %v1899_v13 }
 0x2e6   :  { %752 = vmatprep.subr.bf16.mxu0 %v1883_v61  ;;  %793 = vmatprep.subr.bf16.mxu1 %v1902_v14 }
 0x2e9   :  { %753 = vmatpush1.bf16.msra.mxu0 %v1893_v1  ;;  %794 = vmatpush1.bf16.msra.mxu1 %v1909_v0 }
 0x2ea   :  { %754 = vmatprep.subr.bf16.mxu0 %v1896_v9  ;;  %795 = vmatprep.subr.bf16.mxu1 %v1912_v26 }
 0x2ed   :  { %755 = vmatpush1.bf16.msra.mxu0 %v1905_v15  ;;  %796 = vmatpush1.bf16.msra.mxu1 %v1918_v21 }
 0x2ee   :  { %847 = vmatprep.subr.bf16.mxu0 %v1824_v10  ;;  %888 = vmatprep.subr.bf16.mxu1 %v1837_v41 }
 0x390   :  { %v667_v32 = vpop.f32.mrf.mxu0  ;;  %v708_v25 = vpop.f32.mrf.mxu1 }
 0x391   :  { %v668_v54 = vadd.f32 %v667_v32, %v1745_v2  ;;  %v709_v7 = vadd.f32 %v708_v25, %v1757_v6 }
 0x392   :  { %v669_v48 = vpop.f32.mrf.mxu0  ;;  %v710_v49 = vpop.f32.mrf.mxu1 }
 0x393   :  { %v1348_v31 = vmul.f32 -1.442695, %v668_v54  ;;  %v670_v33 = vadd.f32 %v669_v48, %v1754_v5  ;;  %v1350_v38 = vmul.f32 -1.442695, %v709_v7  ;;  %v711_v8 = vadd.f32 %v710_v49, %v1766_v11 }
 0x394   :  { %v671_v50 = vpop.f32.mrf.mxu0  ;;  %v712_v36 = vpop.f32.mrf.mxu1 }
 0x395   :  { %1470 = vpow2.f32 %v1348_v31  ;;  %v1349_v55 = vmul.f32 -1.442695, %v670_v33 }
 0x396   :  { %v672_v58 = vpop.f32.mrf.mxu0  ;;  %v713_v37 = vpop.f32.mrf.mxu1 }
 0x397   :  { %1472 = vpow2.f32 %v1349_v55 }
 0x398   :  { %1474 = vpow2.f32 %v1350_v38 }
 0x3a2   :  { %v1471_v29 = vpop.eup %1470 }
 0x3a3   :  { %v724_v30 = vadd.f32 1.0, %v1471_v29  ;;  %v2239_v29 = vld [vmem:[#allocation14_spill] sm:$0xff] }
 0x3a4   :  { %v1473_v2 = vpop.eup %1472 }
 0x3a5   :  { %1476 = vrcp.f32 %v724_v30  ;;  %v725_v35 = vadd.f32 1.0, %v1473_v2  ;;  %v1475_v5 = vpop.eup %1474 }
 0x3a6   :  { %1478 = vtanh.f32 %v711_v8  ;;  %v726_v34 = vadd.f32 1.0, %v1475_v5 }
 0x3a7   :  { %1480 = vrcp.f32 %v725_v35  ;;  %v2240_v35 = vld [vmem:[#allocation15_spill] sm:$0xff] }
 0x3a8   :  { %1482 = vrcp.f32 %v726_v34 }
 0x3b2   :  { %v1477_v18 = vpop.eup %1476 }
 0x3b3   :  { %v1479_v16 = vpop.eup %1478 }
 0x3b4   :  { %v1481_v40 = vpop.eup %1480  ;;  %v735_v53 = vmul.f32 %v1479_v16, %v1477_v18 }
 0x3b5   :  { %v734_v12 = vmul.f32 %v1481_v40, %v2005_v39  ;;  %v1483_v11 = vpop.eup %1482 }
 0x3b7   :  { %v2047_v6 = vadd.f32 %v735_v53, %v734_v12 }
 0x3b9   :  { %1484 = vtanh.f32 %v2047_v6 }
 0x3c6   :  { %v1485_v32 = vpop.eup %1484 }
 0x3c7   :  { %v738_v25 = vmul.f32 %v1485_v32, %v1483_v11 }
 0x3c9   :  { %v739_v54 = vpack.c.bf16 %v738_v25, %v738_v25 }
 0x3cb   :  { %773 = vmatmul.mubr.bf16.vlgmr.msra.gmra.mxu0 %v739_v54  ;;  %814 = vmatmul.mubr.bf16.vlgmr.msra.gmra.mxu1 %v739_v54 }
 0x3cc   :  { %848 = vmatpush1.bf16.msra.mxu0 %v1826_v17  ;;  %889 = vmatpush1.bf16.msra.mxu1 %v1839_v43 }
 0x3cd   :  { %849 = vmatprep.subr.bf16.mxu0 %v1829_v24  ;;  %890 = vmatprep.subr.bf16.mxu1 %v1849_v46 }
 0x3ce   :  { %879 = vmatprep.mubr.bf16.mxu0 %v2238_v20  ;;  %920 = vmatprep.mubr.bf16.mxu1 %v2238_v20 }
 0x3d0   :  { %850 = vmatpush1.bf16.msra.mxu0 %v1832_v27  ;;  %891 = vmatpush1.bf16.msra.mxu1 %v1851_v47 }
 0x3d1   :  { %851 = vmatprep.subr.bf16.mxu0 %v1835_v28  ;;  %892 = vmatprep.subr.bf16.mxu1 %v1859_v22 }
 0x3d4   :  { %852 = vmatpush1.bf16.msra.mxu0 %v1842_v44  ;;  %893 = vmatpush1.bf16.msra.mxu1 %v1863_v52 }
 0x3d5   :  { %853 = vmatprep.subr.bf16.mxu0 %v1846_v45  ;;  %894 = vmatprep.subr.bf16.mxu1 %v1866_v23 }
 0x3d8   :  { %854 = vmatpush1.bf16.msra.mxu0 %v1855_v51  ;;  %895 = vmatpush1.bf16.msra.mxu1 %v1875_v57 }
 0x3d9   :  { %855 = vmatprep.subr.bf16.mxu0 %v1857_v19  ;;  %896 = vmatprep.subr.bf16.mxu1 %v1878_v59 }
 0x3dc   :  { %856 = vmatpush1.bf16.msra.mxu0 %v1869_v42  ;;  %897 = vmatpush1.bf16.msra.mxu1 %v1887_v62 }
 0x3dd   :  { %857 = vmatprep.subr.bf16.mxu0 %v1872_v56  ;;  %898 = vmatprep.subr.bf16.mxu1 %v1890_v63 }
 0x3e0   :  { %858 = vmatpush1.bf16.msra.mxu0 %v1881_v60  ;;  %899 = vmatpush1.bf16.msra.mxu1 %v1899_v13 }
 0x3e1   :  { %859 = vmatprep.subr.bf16.mxu0 %v1883_v61  ;;  %900 = vmatprep.subr.bf16.mxu1 %v1902_v14 }
 0x3e4   :  { %860 = vmatpush1.bf16.msra.mxu0 %v1893_v1  ;;  %901 = vmatpush1.bf16.msra.mxu1 %v1909_v0 }
 0x3e5   :  { %861 = vmatprep.subr.bf16.mxu0 %v1896_v9  ;;  %902 = vmatprep.subr.bf16.mxu1 %v1912_v26 }
 0x3e8   :  { %862 = vmatpush1.bf16.msra.mxu0 %v1905_v15  ;;  %903 = vmatpush1.bf16.msra.mxu1 %v1918_v21 }
 0x3e9   :  { %954 = vmatprep.subr.bf16.mxu0 %v1824_v10  ;;  %995 = vmatprep.subr.bf16.mxu1 %v1837_v41 }
 0x48b   :  { %v774_v39 = vpop.f32.mrf.mxu0  ;;  %v815_v48 = vpop.f32.mrf.mxu1 }
 0x48c   :  { %v775_v49 = vadd.f32 %v774_v39, %v1748_v3  ;;  %v816_v8 = vadd.f32 %v815_v48, %v2239_v29 }
 0x48d   :  { %v776_v31 = vpop.f32.mrf.mxu0  ;;  %v817_v33 = vpop.f32.mrf.mxu1 }
 0x48e   :  { %v1351_v50 = vmul.f32 -1.442695, %v775_v49  ;;  %v777_v36 = vadd.f32 %v776_v31, %v1751_v4  ;;  %v1353_v30 = vmul.f32 -1.442695, %v816_v8  ;;  %v818_v5 = vadd.f32 %v817_v33, %v2240_v35  ;;  %v2241_v33 = vld [vmem:[#allocation16_spill] sm:$0xff]  ;;  %v2243_v35 = vld [vmem:[#allocation22_spill] sm:$0xff] }
 0x48f   :  { %v778_v55 = vpop.f32.mrf.mxu0  ;;  %v819_v58 = vpop.f32.mrf.mxu1 }
 0x490   :  { %1486 = vpow2.f32 %v1351_v50  ;;  %v1352_v37 = vmul.f32 -1.442695, %v777_v36 }
 0x491   :  { %v779_v7 = vpop.f32.mrf.mxu0  ;;  %v820_v38 = vpop.f32.mrf.mxu1 }
 0x492   :  { %1488 = vpow2.f32 %v1352_v37  ;;  %v2242_v37 = vld [vmem:[#allocation21_spill] sm:$0xff] }
 0x493   :  { %1490 = vpow2.f32 %v1353_v30 }
 0x49d   :  { %v1487_v2 = vpop.eup %1486 }
 0x49e   :  { %v831_v18 = vadd.f32 1.0, %v1487_v2 }
 0x49f   :  { %v1489_v3 = vpop.eup %1488 }
 0x4a0   :  { %1492 = vrcp.f32 %v831_v18  ;;  %v832_v16 = vadd.f32 1.0, %v1489_v3  ;;  %v1491_v4 = vpop.eup %1490 }
 0x4a1   :  { %1494 = vtanh.f32 %v818_v5  ;;  %v833_v53 = vadd.f32 1.0, %v1491_v4 }
 0x4a2   :  { %1496 = vrcp.f32 %v832_v16  ;;  %v2244_v16 = vld [vmem:[#allocation23_spill] sm:$0xff] }
 0x4a3   :  { %1498 = vrcp.f32 %v833_v53 }
 0x4ad   :  { %v1493_v40 = vpop.eup %1492 }
 0x4ae   :  { %v1495_v34 = vpop.eup %1494 }
 0x4af   :  { %v1497_v12 = vpop.eup %1496  ;;  %v842_v32 = vmul.f32 %v1495_v34, %v1493_v40 }
 0x4b0   :  { %v841_v11 = vmul.f32 %v1497_v12, %v2047_v6  ;;  %v1499_v54 = vpop.eup %1498 }
 0x4b2   :  { %v2089_v25 = vadd.f32 %v842_v32, %v841_v11 }
 0x4b4   :  { %1500 = vtanh.f32 %v2089_v25 }
 0x4c1   :  { %v1501_v39 = vpop.eup %1500 }
 0x4c2   :  { %v845_v48 = vmul.f32 %v1501_v39, %v1499_v54 }
 0x4c4   :  { %v846_v49 = vpack.c.bf16 %v845_v48, %v845_v48 }
 0x4c6   :  { %880 = vmatmul.mubr.bf16.vlgmr.msra.gmra.mxu0 %v846_v49  ;;  %921 = vmatmul.mubr.bf16.vlgmr.msra.gmra.mxu1 %v846_v49 }
 0x4c7   :  { %955 = vmatpush1.bf16.msra.mxu0 %v1826_v17  ;;  %996 = vmatpush1.bf16.msra.mxu1 %v1839_v43 }
 0x4c8   :  { %956 = vmatprep.subr.bf16.mxu0 %v1829_v24  ;;  %997 = vmatprep.subr.bf16.mxu1 %v1849_v46 }
 0x4c9   :  { %986 = vmatprep.mubr.bf16.mxu0 %v2238_v20  ;;  %1027 = vmatprep.mubr.bf16.mxu1 %v2238_v20 }
 0x4cb   :  { %957 = vmatpush1.bf16.msra.mxu0 %v1832_v27  ;;  %998 = vmatpush1.bf16.msra.mxu1 %v1851_v47 }
 0x4cc   :  { %958 = vmatprep.subr.bf16.mxu0 %v1835_v28  ;;  %999 = vmatprep.subr.bf16.mxu1 %v1859_v22 }
 0x4cf   :  { %959 = vmatpush1.bf16.msra.mxu0 %v1842_v44  ;;  %1000 = vmatpush1.bf16.msra.mxu1 %v1863_v52 }
 0x4d0   :  { %960 = vmatprep.subr.bf16.mxu0 %v1846_v45  ;;  %1001 = vmatprep.subr.bf16.mxu1 %v1866_v23 }
 0x4d3   :  { %961 = vmatpush1.bf16.msra.mxu0 %v1855_v51  ;;  %1002 = vmatpush1.bf16.msra.mxu1 %v1875_v57 }
 0x4d4   :  { %962 = vmatprep.subr.bf16.mxu0 %v1857_v19  ;;  %1003 = vmatprep.subr.bf16.mxu1 %v1878_v59 }
 0x4d7   :  { %963 = vmatpush1.bf16.msra.mxu0 %v1869_v42  ;;  %1004 = vmatpush1.bf16.msra.mxu1 %v1887_v62 }
 0x4d8   :  { %964 = vmatprep.subr.bf16.mxu0 %v1872_v56  ;;  %1005 = vmatprep.subr.bf16.mxu1 %v1890_v63 }
 0x4db   :  { %965 = vmatpush1.bf16.msra.mxu0 %v1881_v60  ;;  %1006 = vmatpush1.bf16.msra.mxu1 %v1899_v13 }
 0x4dc   :  { %966 = vmatprep.subr.bf16.mxu0 %v1883_v61  ;;  %1007 = vmatprep.subr.bf16.mxu1 %v1902_v14 }
 0x4df   :  { %967 = vmatpush1.bf16.msra.mxu0 %v1893_v1  ;;  %1008 = vmatpush1.bf16.msra.mxu1 %v1909_v0 }
 0x4e0   :  { %968 = vmatprep.subr.bf16.mxu0 %v1896_v9  ;;  %1009 = vmatprep.subr.bf16.mxu1 %v1912_v26 }
 0x4e3   :  { %969 = vmatpush1.bf16.msra.mxu0 %v1905_v15  ;;  %1010 = vmatpush1.bf16.msra.mxu1 %v1918_v21 }
 0x4e4   :  { %1061 = vmatprep.subr.bf16.mxu0 %v1824_v10  ;;  %1102 = vmatprep.subr.bf16.mxu1 %v1837_v41 }
 0x586   :  { %v881_v6 = vpop.f32.mrf.mxu0  ;;  %v922_v31 = vpop.f32.mrf.mxu1 }
 0x587   :  { %v882_v50 = vadd.f32 %v881_v6, %v2241_v33  ;;  %v923_v5 = vadd.f32 %v922_v31, %v2243_v35 }
 0x588   :  { %v883_v36 = vpop.f32.mrf.mxu0  ;;  %v924_v55 = vpop.f32.mrf.mxu1 }
 0x589   :  { %v1354_v58 = vmul.f32 -1.442695, %v882_v50  ;;  %v884_v7 = vadd.f32 %v883_v36, %v2242_v37  ;;  %v1356_v18 = vmul.f32 -1.442695, %v923_v5  ;;  %v925_v4 = vadd.f32 %v924_v55, %v2244_v16 }
 0x58a   :  { %v885_v38 = vpop.f32.mrf.mxu0  ;;  %v926_v29 = vpop.f32.mrf.mxu1 }
 0x58b   :  { %1502 = vpow2.f32 %v1354_v58  ;;  %v1355_v8 = vmul.f32 -1.442695, %v884_v7 }
 0x58c   :  { %v886_v30 = vpop.f32.mrf.mxu0  ;;  %v927_v2 = vpop.f32.mrf.mxu1 }
 0x58d   :  { %1504 = vpow2.f32 %v1355_v8 }
 0x58e   :  { %1506 = vpow2.f32 %v1356_v18 }
 0x598   :  { %v1503_v3 = vpop.eup %1502 }
 0x599   :  { %v938_v40 = vadd.f32 1.0, %v1503_v3 }
 0x59a   :  { %v1505_v34 = vpop.eup %1504 }
 0x59b   :  { %1508 = vrcp.f32 %v938_v40  ;;  %v939_v12 = vadd.f32 1.0, %v1505_v34  ;;  %v1507_v53 = vpop.eup %1506  ;;  %v1566_v34 = vld [vmem:[#allocation2 + $0xe0] ss:$16 sps:$4 sm:$0xff]  }
 0x59c   :  { %1510 = vtanh.f32 %v925_v4  ;;  %v940_v39 = vadd.f32 1.0, %v1507_v53  ;;  %v1568_v53 = vld [vmem:[#allocation2 + $0xc4] ss:$16 sps:$4 sm:$0xff]  }
 0x59d   :  { %1512 = vrcp.f32 %v939_v12  ;;  %v1567_v12 = vld [vmem:[#allocation2 + $0xe8] ss:$16 sps:$4 sm:$0xff]  }
 0x59e   :  { %1514 = vrcp.f32 %v940_v39  ;;  %v1572_v39 = vld [vmem:[#allocation2 + $0xa4] ss:$16 sps:$4 sm:$0xff]  }
 0x5a8   :  { %v1509_v11 = vpop.eup %1508 }
 0x5a9   :  { %v1511_v32 = vpop.eup %1510 }
 0x5aa   :  { %v1513_v54 = vpop.eup %1512  ;;  %v949_v49 = vmul.f32 %v1511_v32, %v1509_v11  ;;  %v1569_v11 = vld [vmem:[#allocation2 + $0xcc] ss:$16 sps:$4 sm:$0xff]   ;;  %v1570_v32 = vld [vmem:[#allocation2 + $0xc0] ss:$16 sps:$4 sm:$0xff]  }
 0x5ab   :  { %v948_v48 = vmul.f32 %v1513_v54, %v2089_v25  ;;  %v1515_v31 = vpop.eup %1514  ;;  %v2248_v25 = vld [vmem:[#allocation20_spill] sm:$0xff] }
 0x5ac   :  { %v1571_v54 = vld [vmem:[#allocation2 + $0xc8] ss:$16 sps:$4 sm:$0xff]  }
 0x5ad   :  { %v2131_v6 = vadd.f32 %v949_v49, %v948_v48  ;;  %v1573_v48 = vld [vmem:[#allocation2 + $0xac] ss:$16 sps:$4 sm:$0xff]   ;;  %v1574_v49 = vld [vmem:[#allocation2 + $0xa0] ss:$16 sps:$4 sm:$0xff]  }
 0x5af   :  { %1516 = vtanh.f32 %v2131_v6 }
 0x5bc   :  { %v1517_v33 = vpop.eup %1516 }
 0x5bd   :  { %v952_v50 = vmul.f32 %v1517_v33, %v1515_v31  ;;  %v1576_v31 = vld [vmem:[#allocation2 + $0x84] ss:$16 sps:$4 sm:$0xff]   ;;  %v1577_v33 = vld [vmem:[#allocation2 + $0x8c] ss:$16 sps:$4 sm:$0xff]  }
 0x5bf   :  { %v953_v36 = vpack.c.bf16 %v952_v50, %v952_v50  ;;  %v1578_v50 = vld [vmem:[#allocation2 + $0x80] ss:$16 sps:$4 sm:$0xff]  }
 0x5c1   :  { %987 = vmatmul.mubr.bf16.vlgmr.msra.gmra.mxu0 %v953_v36  ;;  %1028 = vmatmul.mubr.bf16.vlgmr.msra.gmra.mxu1 %v953_v36  ;;  %v1580_v36 = vld [vmem:[#allocation2 + $0x60] ss:$16 sps:$4 sm:$0xff]  }
 0x5c2   :  { %1062 = vmatpush1.bf16.msra.mxu0 %v1826_v17  ;;  %1103 = vmatpush1.bf16.msra.mxu1 %v1839_v43 }
 0x5c3   :  { %1063 = vmatprep.subr.bf16.mxu0 %v1829_v24  ;;  %1104 = vmatprep.subr.bf16.mxu1 %v1849_v46  ;;  %v2246_v46 = vld [vmem:[#allocation18_spill] sm:$0xff] }
 0x5c4   :  { %1093 = vmatprep.mubr.bf16.mxu0 %v2238_v20  ;;  %1134 = vmatprep.mubr.bf16.mxu1 %v2238_v20 }
 0x5c6   :  { %1064 = vmatpush1.bf16.msra.mxu0 %v1832_v27  ;;  %1105 = vmatpush1.bf16.msra.mxu1 %v1851_v47  ;;  %v2245_v27 = vld [vmem:[#allocation17_spill] sm:$0xff] }
 0x5c7   :  { %1065 = vmatprep.subr.bf16.mxu0 %v1835_v28  ;;  %1106 = vmatprep.subr.bf16.mxu1 %v1859_v22 }
 0x5ca   :  { %1066 = vmatpush1.bf16.msra.mxu0 %v1842_v44  ;;  %1107 = vmatpush1.bf16.msra.mxu1 %v1863_v52 }
 0x5cb   :  { %1067 = vmatprep.subr.bf16.mxu0 %v1846_v45  ;;  %1108 = vmatprep.subr.bf16.mxu1 %v1866_v23 }
 0x5ce   :  { %1068 = vmatpush1.bf16.msra.mxu0 %v1855_v51  ;;  %1109 = vmatpush1.bf16.msra.mxu1 %v1875_v57 }
 0x5cf   :  { %1069 = vmatprep.subr.bf16.mxu0 %v1857_v19  ;;  %1110 = vmatprep.subr.bf16.mxu1 %v1878_v59 }
 0x5d2   :  { %1070 = vmatpush1.bf16.msra.mxu0 %v1869_v42  ;;  %1111 = vmatpush1.bf16.msra.mxu1 %v1887_v62  ;;  %v2247_v42 = vld [vmem:[#allocation19_spill] sm:$0xff] }
 0x5d3   :  { %1071 = vmatprep.subr.bf16.mxu0 %v1872_v56  ;;  %1112 = vmatprep.subr.bf16.mxu1 %v1890_v63 }
 0x5d6   :  { %1072 = vmatpush1.bf16.msra.mxu0 %v1881_v60  ;;  %1113 = vmatpush1.bf16.msra.mxu1 %v1899_v13 }
 0x5d7   :  { %1073 = vmatprep.subr.bf16.mxu0 %v1883_v61  ;;  %1114 = vmatprep.subr.bf16.mxu1 %v1902_v14 }
 0x5da   :  { %1074 = vmatpush1.bf16.msra.mxu0 %v1893_v1  ;;  %1115 = vmatpush1.bf16.msra.mxu1 %v1909_v0 }
 0x5db   :  { %1075 = vmatprep.subr.bf16.mxu0 %v1896_v9  ;;  %1116 = vmatprep.subr.bf16.mxu1 %v1912_v26 }
 0x5de   :  { %1076 = vmatpush1.bf16.msra.mxu0 %v1905_v15  ;;  %1117 = vmatpush1.bf16.msra.mxu1 %v1918_v21 }
 0x5df   :  { %1168 = vmatprep.subr.bf16.mxu0 %v1824_v10  ;;  %1209 = vmatprep.subr.bf16.mxu1 %v1837_v41 }
 0x681   :  { %v988_v17 = vpop.f32.mrf.mxu0  ;;  %v1029_v24 = vpop.f32.mrf.mxu1 }
 0x682   :  { %v989_v28 = vadd.f32 %v988_v17, %v2245_v27  ;;  %v1030_v10 = vadd.f32 %v1029_v24, %v2247_v42  ;;  %v1581_v17 = vld [vmem:[#allocation2 + $0x44] ss:$16 sps:$4 sm:$0xff]  }
 0x683   :  { %v990_v43 = vpop.f32.mrf.mxu0  ;;  %v1031_v44 = vpop.f32.mrf.mxu1 }
 0x684   :  { %v1357_v45 = vmul.f32 -1.442695, %v989_v28  ;;  %v991_v47 = vadd.f32 %v990_v43, %v2246_v46  ;;  %v1359_v56 = vmul.f32 -1.442695, %v1030_v10  ;;  %v1032_v55 = vadd.f32 %v1031_v44, %v2248_v25  ;;  %v2252_v44 = vld [vmem:[#allocation27_spill] sm:$0xff] }
 0x685   :  { %v992_v51 = vpop.f32.mrf.mxu0  ;;  %v1033_v19 = vpop.f32.mrf.mxu1 }
 0x686   :  { %1518 = vpow2.f32 %v1357_v45  ;;  %v1358_v22 = vmul.f32 -1.442695, %v991_v47 }
 0x687   :  { %v993_v52 = vpop.f32.mrf.mxu0  ;;  %v1034_v23 = vpop.f32.mrf.mxu1 }
 0x688   :  { %1520 = vpow2.f32 %v1358_v22 }
 0x689   :  { %1522 = vpow2.f32 %v1359_v56 }
 0x693   :  { %v1519_v41 = vpop.eup %1518 }
 0x694   :  { %v1045_v58 = vadd.f32 1.0, %v1519_v41 }
 0x695   :  { %v1521_v37 = vpop.eup %1520 }
 0x696   :  { %1524 = vrcp.f32 %v1045_v58  ;;  %v1046_v7 = vadd.f32 1.0, %v1521_v37  ;;  %v1523_v38 = vpop.eup %1522 }
 0x697   :  { %1526 = vtanh.f32 %v1032_v55  ;;  %v1047_v2 = vadd.f32 1.0, %v1523_v38 }
 0x698   :  { %1528 = vrcp.f32 %v1046_v7 }
 0x699   :  { %1530 = vrcp.f32 %v1047_v2 }
 0x6a3   :  { %v1525_v29 = vpop.eup %1524 }
 0x6a4   :  { %v1527_v8 = vpop.eup %1526 }
 0x6a5   :  { %v1529_v30 = vpop.eup %1528  ;;  %v1056_v5 = vmul.f32 %v1527_v8, %v1525_v29  ;;  %v2253_v29 = vld [vmem:[#allocation10_spill] sm:$0xff] }
 0x6a6   :  { %v1055_v35 = vmul.f32 %v1529_v30, %v2131_v6  ;;  %v1531_v3 = vpop.eup %1530  ;;  %v1575_v6 = vld [vmem:[#allocation2 + $0xa8] ss:$16 sps:$4 sm:$0xff]  }
 0x6a8   :  { %v2173_v18 = vadd.f32 %v1056_v5, %v1055_v35  ;;  %v2254_v5 = vld [vmem:[#allocation11_spill] sm:$0xff] }
 0x6aa   :  { %1532 = vtanh.f32 %v2173_v18 }
 0x6b7   :  { %v1533_v16 = vpop.eup %1532 }
 0x6b8   :  { %v1059_v4 = vmul.f32 %v1533_v16, %v1531_v3 }
 0x6ba   :  { %v1060_v40 = vpack.c.bf16 %v1059_v4, %v1059_v4 }
 0x6bc   :  { %1094 = vmatmul.mubr.bf16.vlgmr.msra.gmra.mxu0 %v1060_v40  ;;  %1135 = vmatmul.mubr.bf16.vlgmr.msra.gmra.mxu1 %v1060_v40 }
 0x6bd   :  { %1169 = vmatpush1.bf16.msra.mxu0 %v1566_v34  ;;  %1210 = vmatpush1.bf16.msra.mxu1 %v1567_v12  ;;  %v2255_v12 = vld [vmem:[#allocation12_spill] sm:$0xff] }
 0x6be   :  { %1170 = vmatprep.subr.bf16.mxu0 %v1568_v53  ;;  %1211 = vmatprep.subr.bf16.mxu1 %v1569_v11 }
 0x6bf   :  { %1200 = vmatprep.mubr.bf16.mxu0 %v2238_v20  ;;  %1241 = vmatprep.mubr.bf16.mxu1 %v2238_v20  ;;  %v1579_v20 = vld [vmem:[#allocation2 + $0x64] ss:$16 sps:$4 sm:$0xff]  }
 0x6c1   :  { %1171 = vmatpush1.bf16.msra.mxu0 %v1570_v32  ;;  %1212 = vmatpush1.bf16.msra.mxu1 %v1571_v54  ;;  %v2256_v54 = vld [vmem:[#allocation13_spill] sm:$0xff] }
 0x6c2   :  { %1172 = vmatprep.subr.bf16.mxu0 %v1572_v39  ;;  %1213 = vmatprep.subr.bf16.mxu1 %v1573_v48 }
 0x6c5   :  { %1173 = vmatpush1.bf16.msra.mxu0 %v1574_v49  ;;  %1214 = vmatpush1.bf16.msra.mxu1 %v1575_v6 }
 0x6c6   :  { %1174 = vmatprep.subr.bf16.mxu0 %v1576_v31  ;;  %1215 = vmatprep.subr.bf16.mxu1 %v1577_v33 }
 0x6c9   :  { %1175 = vmatpush1.bf16.msra.mxu0 %v1578_v50  ;;  %1216 = vmatpush1.bf16.msra.mxu1 %v1875_v57 }
 0x6ca   :  { %1176 = vmatprep.subr.bf16.mxu0 %v1579_v20  ;;  %1217 = vmatprep.subr.bf16.mxu1 %v1878_v59 }
 0x6cd   :  { %1177 = vmatpush1.bf16.msra.mxu0 %v1580_v36  ;;  %1218 = vmatpush1.bf16.msra.mxu1 %v1887_v62 }
 0x6ce   :  { %1178 = vmatprep.subr.bf16.mxu0 %v1581_v17  ;;  %1219 = vmatprep.subr.bf16.mxu1 %v1890_v63 }
 0x6d1   :  { %1179 = vmatpush1.bf16.msra.mxu0 %v1881_v60  ;;  %1220 = vmatpush1.bf16.msra.mxu1 %v1899_v13  ;;  %v2249_v60 = vld [vmem:[#allocation24_spill] sm:$0xff] }
 0x6d2   :  { %1180 = vmatprep.subr.bf16.mxu0 %v1883_v61  ;;  %1221 = vmatprep.subr.bf16.mxu1 %v1902_v14  ;;  %v2250_v14 = vld [vmem:[#allocation25_spill] sm:$0xff] }
 0x6d5   :  { %1181 = vmatpush1.bf16.msra.mxu0 %v1893_v1  ;;  %1222 = vmatpush1.bf16.msra.mxu1 %v1909_v0 }
 0x6d6   :  { %1182 = vmatprep.subr.bf16.mxu0 %v1896_v9  ;;  %1223 = vmatprep.subr.bf16.mxu1 %v1912_v26  ;;  %v2251_v26 = vld [vmem:[#allocation26_spill] sm:$0xff] }
 0x6d9   :  { %1183 = vmatpush1.bf16.msra.mxu0 %v1905_v15  ;;  %1224 = vmatpush1.bf16.msra.mxu1 %v1918_v21 }
 0x77c   :  { %v1095_v57 = vpop.f32.mrf.mxu0  ;;  %v1136_v59 = vpop.f32.mrf.mxu1 }
 0x77d   :  { %v1096_v62 = vadd.f32 %v1095_v57, %v2249_v60  ;;  %v1137_v15 = vadd.f32 %v1136_v59, %v2251_v26 }
 0x77e   :  { %v1097_v63 = vpop.f32.mrf.mxu0  ;;  %v1138_v61 = vpop.f32.mrf.mxu1 }
 0x77f   :  { %v1360_v13 = vmul.f32 -1.442695, %v1096_v62  ;;  %v1098_v24 = vadd.f32 %v1097_v63, %v2250_v14  ;;  %v1362_v43 = vmul.f32 -1.442695, %v1137_v15  ;;  %v1139_v45 = vadd.f32 %v1138_v61, %v2252_v44  ;;  %v1366_v63 = vld [vmem:[%s2210_s4] ss:$0 sm:$0xff] }
 0x780   :  { %v1099_v1 = vpop.f32.mrf.mxu0  ;;  %v1140_v27 = vpop.f32.mrf.mxu1 }
 0x781   :  { %1534 = vpow2.f32 %v1360_v13  ;;  %v1361_v0 = vmul.f32 -1.442695, %v1098_v24  ;;  %v1367_v24 = vld [vmem:[#allocation4] ss:$0 sm:$0xff] }
 0x782   :  { %v1100_v9 = vpop.f32.mrf.mxu0  ;;  %v1141_v28 = vpop.f32.mrf.mxu1 }
 0x783   :  { %1536 = vpow2.f32 %v1361_v0 }
 0x784   :  { %1538 = vpow2.f32 %v1362_v43 }
 0x78e   :  { %v1535_v21 = vpop.eup %1534 }
 0x78f   :  { %v1152_v46 = vadd.f32 1.0, %v1535_v21 }
 0x790   :  { %v1537_v47 = vpop.eup %1536 }
 0x791   :  { %1540 = vrcp.f32 %v1152_v46  ;;  %v1153_v51 = vadd.f32 1.0, %v1537_v47  ;;  %v1539_v19 = vpop.eup %1538 }
 0x792   :  { %1542 = vtanh.f32 %v1139_v45  ;;  %v1154_v42 = vadd.f32 1.0, %v1539_v19 }
 0x793   :  { %1544 = vrcp.f32 %v1153_v51 }
 0x794   :  { %1546 = vrcp.f32 %v1154_v42 }
 0x79e   :  { %v1541_v22 = vpop.eup %1540 }
 0x79f   :  { %v1543_v52 = vpop.eup %1542 }
 0x7a0   :  { %v1545_v23 = vpop.eup %1544  ;;  %v1163_v56 = vmul.f32 %v1543_v52, %v1541_v22 }
 0x7a1   :  { %v1162_v10 = vmul.f32 %v1545_v23, %v2173_v18  ;;  %v1547_v25 = vpop.eup %1546 }
 0x7a3   :  { %v1164_v41 = vadd.f32 %v1163_v56, %v1162_v10 }
 0x7a5   :  { %1548 = vtanh.f32 %v1164_v41 }
 0x7b2   :  { %v1549_v55 = vpop.eup %1548 }
 0x7b3   :  { %v1166_v58 = vmul.f32 %v1549_v55, %v1547_v25 }
 0x7b5   :  { %v1167_v37 = vpack.c.bf16 %v1166_v58, %v1166_v58 }
 0x7b7   :  { %1201 = vmatmul.mubr.bf16.vlgmr.msra.gmra.mxu0 %v1167_v37  ;;  %1242 = vmatmul.mubr.bf16.vlgmr.msra.gmra.mxu1 %v1167_v37 }
 0x877   :  { %v1202_v7 = vpop.f32.mrf.mxu0  ;;  %v1243_v38 = vpop.f32.mrf.mxu1 }
 0x878   :  { %v1203_v8 = vadd.f32 %v1202_v7, %v2253_v29  ;;  %v1244_v53 = vadd.f32 %v1243_v38, %v2255_v12 }
 0x879   :  { %v1204_v30 = vpop.f32.mrf.mxu0  ;;  %v1245_v2 = vpop.f32.mrf.mxu1 }
 0x87a   :  { %v1363_v35 = vmul.f32 -1.442695, %v1203_v8  ;;  %v1205_v3 = vadd.f32 %v1204_v30, %v2254_v5  ;;  %v1365_v11 = vmul.f32 -1.442695, %v1244_v53  ;;  %v1246_v39 = vadd.f32 %v1245_v2, %v2256_v54 }
 0x87b   :  { %v1206_v18 = vpop.f32.mrf.mxu0  ;;  %v1247_v16 = vpop.f32.mrf.mxu1 }
 0x87c   :  { %1550 = vpow2.f32 %v1363_v35  ;;  %v1364_v4 = vmul.f32 -1.442695, %v1205_v3 }
 0x87d   :  { %v1207_v40 = vpop.f32.mrf.mxu0  ;;  %v1248_v34 = vpop.f32.mrf.mxu1 }
 0x87e   :  { %1552 = vpow2.f32 %v1364_v4 }
 0x87f   :  { %1554 = vpow2.f32 %v1365_v11 }
 0x889   :  { %v1551_v32 = vpop.eup %1550 }
 0x88a   :  { %v1259_v48 = vadd.f32 1.0, %v1551_v32 }
 0x88b   :  { %v1553_v49 = vpop.eup %1552 }
 0x88c   :  { %1556 = vrcp.f32 %v1259_v48  ;;  %v1260_v6 = vadd.f32 1.0, %v1553_v49  ;;  %v1555_v31 = vpop.eup %1554 }
 0x88d   :  { %1558 = vtanh.f32 %v1246_v39  ;;  %v1261_v36 = vadd.f32 1.0, %v1555_v31 }
 0x88e   :  { %1560 = vrcp.f32 %v1260_v6 }
 0x88f   :  { %1562 = vrcp.f32 %v1261_v36 }
 0x899   :  { %v1557_v33 = vpop.eup %1556 }
 0x89a   :  { %v1559_v50 = vpop.eup %1558 }
 0x89b   :  { %v1561_v20 = vpop.eup %1560  ;;  %v1270_v57 = vmul.f32 %v1559_v50, %v1557_v33 }
 0x89c   :  { %v1269_v17 = vmul.f32 %v1561_v20, %v1164_v41  ;;  %v1563_v60 = vpop.eup %1562 }
 0x89e   :  { %v1271_v59 = vadd.f32 %v1270_v57, %v1269_v17 }
 0x8a0   :  { %1564 = vtanh.f32 %v1271_v59 }
 0x8ad   :  { %v1565_v62 = vpop.eup %1564 }
 0x8ae   :  { %v1273_v61 = vmul.f32 %v1565_v62, %v1563_v60 }
 0x8b0   :  { %v1281_v13 = vmul.f32 %v1366_v63, %v1273_v61 }
 0x8b2   :  { %v1283_v14 = vsel %vm1282_vm1, %v1281_v13, 0.0 }
 0x8b3   :  { %1284 = vadd.xlane.f32.xlu0 %v1283_v14 }
 0x93c   :  { %v1285_v1 = vpop.xlane.xlu0 %1284 }
 0x93d   :  { %v1293_v27 = vadd.f32 %v1367_v24, %v1285_v1 }
 0x93f   :  { %1295 = vst.msk [vmem:[%s2211_s6] sm:$0x3] %vm1294_vm2, %v1293_v27 }
 0x940   :  { %1300 = vsyncmov [#allocation3] }
 0x943   :  { %s1301_s23 = vpop.sfrf %1300 }
 0x944   :  { %p1368_p5 = scmp.ne.s32.totalorder %s1301_s23, 0 }
 0x946   :  { %1305 = shalt.err (%p1368_p5)  }

</bundles_post_ra>
